<compile_context>
chip_gen: v5e
topology: v5e:2x2
jax: 0.10.0
libtpu: 0.0.40
codegen_flags: <defaults>
</compile_context>

<pallas_src>
import functools

import jax
import jax.numpy as jnp
from jax.experimental import pallas as pl
from jax.experimental.pallas import tpu as pltpu


# ----------------------------------------------------------------------------
# helpers
# ----------------------------------------------------------------------------
def _conv_out(size, k, s):
    return (size - k) // s + 1


def _conv1_patches_parity(x, k=8, s=4):
    """x: (N, C, H, W) f32 -> (N, OH*OW, C*k*k) bf16.

    Rows are ordered (ry, rx, hy, hx) where the conv1 output pixel is
    (oy, ox) = (2*hy + ry, 2*hx + rx); feature (column) order is (c, kh, kw),
    matching PyTorch's weight.reshape(OC, C*k*k)."""
    N, C, H, W = x.shape
    OH, OW = _conv_out(H, k, s), _conv_out(W, k, s)
    assert OH % 2 == 0 and OW % 2 == 0, "parity-plane layout needs even conv1 output"
    patches = jax.lax.conv_general_dilated_patches(
        x, (k, k), (s, s), padding="VALID",
        dimension_numbers=("NCHW", "OIHW", "NCHW"))          # (N, C*k*k, OH, OW)
    hy, hx = OH // 2, OW // 2
    ckk = C * k * k
    p = patches.reshape(N, ckk, hy, 2, hx, 2)                 # oy=(hy,ry), ox=(hx,rx)
    p = p.transpose(0, 3, 5, 2, 4, 1)                         # (N, ry, rx, hy, hx, ckk)
    return p.reshape(N, OH * OW, ckk).astype(jnp.bfloat16)


def _pack_params(params, oh3, ow3, a_pad):
    """Rearrange PyTorch-layout weights into the kernel's matmul layouts."""
    bf16, f32 = jnp.bfloat16, jnp.float32
    w1 = params["conv1_w"]                                    # (32, C, 8, 8)
    oc1, cin, k1, _ = w1.shape
    w1m = w1.reshape(oc1, cin * k1 * k1).T.astype(bf16)       # (C*64, 32)
    b1 = params["conv1_b"].reshape(1, -1).astype(f32)
    w2 = params["conv2_w"]                                    # (64, 32, 4, 4)
    w2m = w2.transpose(2, 3, 1, 0).reshape(16, w2.shape[1], w2.shape[0]).astype(bf16)
    b2 = params["conv2_b"].reshape(1, -1).astype(f32)
    w3 = params["conv3_w"]                                    # (64, 64, 3, 3)
    w3m = w3.transpose(2, 3, 1, 0).reshape(9, w3.shape[1], w3.shape[0]).astype(bf16)
    b3 = params["conv3_b"].reshape(1, -1).astype(f32)
    w4 = params["fc4_w"]                                      # (512, 64*oh3*ow3)
    w4m = w4.reshape(512, 64, oh3 * ow3).transpose(2, 1, 0).astype(bf16)  # (P, 64, 512)
    b4 = params["fc4_b"].reshape(1, -1).astype(f32)
    w5 = params["fc5_w"]                                      # (A, 512)
    acts = w5.shape[0]
    w5m = jnp.zeros((512, a_pad), bf16).at[:, :acts].set(w5.T.astype(bf16))
    b5 = jnp.zeros((1, a_pad), f32).at[0, :acts].set(params["fc5_b"].astype(f32))
    return w1m, b1, w2m, b2, w3m, b3, w4m, b4, w5m, b5


# ----------------------------------------------------------------------------
# Fused Pallas kernel: one image per grid step, everything in VMEM
# ----------------------------------------------------------------------------
def _dqn_fused_kernel(cols_ref, w1_ref, b1_ref, w2_ref, b2_ref, w3_ref, b3_ref,
                      w4_ref, b4_ref, w5_ref, b5_ref, out_ref, *,
                      oh1, ow1, oh2, ow2, oh3, ow3):
    f32, bf16 = jnp.float32, jnp.bfloat16

    # conv1: single MXU matmul (rows = parity-ordered output pixels).
    a1 = jnp.dot(cols_ref[0], w1_ref[...], preferred_element_type=f32)
    a1 = jnp.maximum(a1 + b1_ref[...], 0.0)                   # (oh1*ow1, 32) f32

    hy, hx = oh1 // 2, ow1 // 2

    # conv2 (k=4, s=2): shift-and-accumulate over the 16 taps. Parity-ordered
    # rows make every tap's window a set of contiguous row slices.
    acc2 = jnp.zeros((oh2 * ow2, w2_ref.shape[2]), f32)
    for dy in range(4):
        for dx in range(4):
            ry, qy = dy % 2, dy // 2
            rx, qx = dx % 2, dx // 2
            base = (ry * 2 + rx) * (hy * hx)
            rows = [a1[base + (qy + oy) * hx + qx:
                       base + (qy + oy) * hx + qx + ow2, :] for oy in range(oh2)]
            window = jnp.concatenate(rows, axis=0).astype(bf16)      # (oh2*ow2, 32)
            acc2 = acc2 + jnp.dot(window, w2_ref[dy * 4 + dx],
                                  preferred_element_type=f32)
    a2 = jnp.maximum(acc2 + b2_ref[...], 0.0)                 # (oh2*ow2, 64) f32

    # conv3 (k=3, s=1): rows of a2 are (oy, ox) row-major -> contiguous slices.
    acc3 = jnp.zeros((oh3 * ow3, w3_ref.shape[2]), f32)
    for dy in range(3):
        for dx in range(3):
            rows = [a2[(oy + dy) * ow2 + dx:(oy + dy) * ow2 + dx + ow3, :]
                    for oy in range(oh3)]
            window = jnp.concatenate(rows, axis=0).astype(bf16)      # (oh3*ow3, 64)
            acc3 = acc3 + jnp.dot(window, w3_ref[dy * 3 + dx],
                                  preferred_element_type=f32)
    a3 = jnp.maximum(acc3 + b3_ref[...], 0.0)                 # (oh3*ow3, 64) f32

    # fc4 (+ReLU) and fc5, fused: hidden vector stays in VMEM.
    acc4 = jnp.zeros((1, w4_ref.shape[2]), f32)
    for p in range(oh3 * ow3):
        acc4 = acc4 + jnp.dot(a3[p:p + 1, :].astype(bf16), w4_ref[p],
                              preferred_element_type=f32)
    a4 = jnp.maximum(acc4 + b4_ref[...], 0.0).astype(bf16)    # (1, 512)
    out = jnp.dot(a4, w5_ref[...], preferred_element_type=f32) + b5_ref[...]
    out_ref[0] = out.astype(out_ref.dtype)                    # (1, A_pad), lane-dense


# ----------------------------------------------------------------------------
# Forward pass
# ----------------------------------------------------------------------------
def dqn_nature_forward(params, x):
    """x: (N, C, H, W) float32 -> (N, actions) float32."""
    N, C, H, W = x.shape
    oh1, ow1 = _conv_out(H, 8, 4), _conv_out(W, 8, 4)
    oh2, ow2 = _conv_out(oh1, 4, 2), _conv_out(ow1, 4, 2)
    oh3, ow3 = _conv_out(oh2, 3, 1), _conv_out(ow2, 3, 1)
    actions = params["fc5_w"].shape[0]
    a_pad = ((actions + 127) // 128) * 128

    cols1 = _conv1_patches_parity(x)                          # (N, oh1*ow1, C*64) bf16
    packed = _pack_params(params, oh3, ow3, a_pad)

    kernel = functools.partial(_dqn_fused_kernel, oh1=oh1, ow1=ow1,
                               oh2=oh2, ow2=ow2, oh3=oh3, ow3=ow3)

    const2 = lambda n: (0, 0)
    const3 = lambda n: (0, 0, 0)
    in_specs = [pl.BlockSpec((1, oh1 * ow1, C * 64), lambda n: (n, 0, 0))]
    for arr in packed:
        in_specs.append(pl.BlockSpec(arr.shape, const2 if arr.ndim == 2 else const3))

    out = pl.pallas_call(
        kernel,
        out_shape=jax.ShapeDtypeStruct((N, 1, a_pad), jnp.float32),
        grid=(N,),
        in_specs=in_specs,
        out_specs=pl.BlockSpec((1, 1, a_pad), lambda n: (n, 0, 0)),
        compiler_params=pltpu.CompilerParams(
            dimension_semantics=("parallel",),
            vmem_limit_bytes=32 * 1024 * 1024),
    )(cols1, *packed)
    return out[:, 0, :actions]


# ----------------------------------------------------------------------------
# Reference (pure XLA, f32) and parameter init
# ----------------------------------------------------------------------------
def reference_forward(params, x):
    dn = ("NCHW", "OIHW", "NCHW")
    y = jax.lax.conv_general_dilated(x, params["conv1_w"], (4, 4), "VALID", dimension_numbers=dn)
    y = jax.nn.relu(y + params["conv1_b"][None, :, None, None])
    y = jax.lax.conv_general_dilated(y, params["conv2_w"], (2, 2), "VALID", dimension_numbers=dn)
    y = jax.nn.relu(y + params["conv2_b"][None, :, None, None])
    y = jax.lax.conv_general_dilated(y, params["conv3_w"], (1, 1), "VALID", dimension_numbers=dn)
    y = jax.nn.relu(y + params["conv3_b"][None, :, None, None])
    y = y.reshape(y.shape[0], -1)
    y = jax.nn.relu(y @ params["fc4_w"].T + params["fc4_b"])
    return y @ params["fc5_w"].T + params["fc5_b"]


def init_params(key, in_channels, spatial, actions):
    h1 = _conv_out(spatial, 8, 4)
    h2 = _conv_out(h1, 4, 2)
    h3 = _conv_out(h2, 3, 1)
    feat = 64 * h3 * h3
    keys = jax.random.split(key, 10)
    s = 0.05
    return {
        "conv1_w": jax.random.normal(keys[0], (32, in_channels, 8, 8), jnp.float32) * s,
        "conv1_b": jax.random.normal(keys[1], (32,), jnp.float32) * s,
        "conv2_w": jax.random.normal(keys[2], (64, 32, 4, 4), jnp.float32) * s,
        "conv2_b": jax.random.normal(keys[3], (64,), jnp.float32) * s,
        "conv3_w": jax.random.normal(keys[4], (64, 64, 3, 3), jnp.float32) * s,
        "conv3_b": jax.random.normal(keys[5], (64,), jnp.float32) * s,
        "fc4_w": jax.random.normal(keys[6], (512, feat), jnp.float32) * s,
        "fc4_b": jax.random.normal(keys[7], (512,), jnp.float32) * s,
        "fc5_w": jax.random.normal(keys[8], (actions, 512), jnp.float32) * s,
        "fc5_b": jax.random.normal(keys[9], (actions,), jnp.float32) * s,
    }


if __name__ == "__main__":
    # 36 -> (36-8)/4+1=8 -> (8-4)/2+1=3 -> (3-3)/1+1=1  => fc4 feature size 64
    batch, channels, spatial, actions = 2, 4, 36, 6

    key = jax.random.PRNGKey(0)
    pkey, xkey = jax.random.split(key)
    params = init_params(pkey, channels, spatial, actions)
    x = jax.random.normal(xkey, (batch, channels, spatial, spatial), jnp.float32)

    out = jax.jit(dqn_nature_forward)(params, x)
    out = jax.block_until_ready(out)
    assert out.shape == (batch, actions), out.shape

    # Loose tolerance: kernel uses bf16 matmul operands with f32 accumulation.
    ref = reference_forward(params, x)
    err = float(jnp.max(jnp.abs(out - ref)))
    if err > 3e-2:
        raise AssertionError(f"kernel mismatch vs reference: max abs err {err}")

    print("KERNEL_OK")
</pallas_src>

<mosaic_0001>
module attributes {stable_mosaic.version = 11 : i64} {
  func.func @_dqn_fused_kernel(%arg0: i32, %arg1: memref<1x64x256xbf16, #tpu.memory_space<vmem>>, %arg2: memref<256x32xbf16, #tpu.memory_space<vmem>>, %arg3: memref<1x32xf32, #tpu.memory_space<vmem>>, %arg4: memref<16x32x64xbf16, #tpu.memory_space<vmem>>, %arg5: memref<1x64xf32, #tpu.memory_space<vmem>>, %arg6: memref<9x64x64xbf16, #tpu.memory_space<vmem>>, %arg7: memref<1x64xf32, #tpu.memory_space<vmem>>, %arg8: memref<1x64x512xbf16, #tpu.memory_space<vmem>>, %arg9: memref<1x512xf32, #tpu.memory_space<vmem>>, %arg10: memref<512x128xbf16, #tpu.memory_space<vmem>>, %arg11: memref<1x128xf32, #tpu.memory_space<vmem>>, %arg12: memref<1x1x128xf32, #tpu.memory_space<vmem>>) attributes {dimension_semantics = [#tpu.dimension_semantics<parallel>], iteration_bounds = array<i64: 2>, scalar_prefetch = 0 : i64, scratch_operands = 0 : i64, tpu.core_type = #tpu.core_type<tc>, window_params = [{transform_indices = @transform_0, window_bounds = array<i64: 1, 64, 256>}, {pipeline_mode = #tpu.pipeline_mode<synchronous>, transform_indices = @transform_1, window_bounds = array<i64: 256, 32>}, {pipeline_mode = #tpu.pipeline_mode<synchronous>, transform_indices = @transform_2, window_bounds = array<i64: 1, 32>}, {pipeline_mode = #tpu.pipeline_mode<synchronous>, transform_indices = @transform_3, window_bounds = array<i64: 16, 32, 64>}, {pipeline_mode = #tpu.pipeline_mode<synchronous>, transform_indices = @transform_4, window_bounds = array<i64: 1, 64>}, {pipeline_mode = #tpu.pipeline_mode<synchronous>, transform_indices = @transform_5, window_bounds = array<i64: 9, 64, 64>}, {pipeline_mode = #tpu.pipeline_mode<synchronous>, transform_indices = @transform_6, window_bounds = array<i64: 1, 64>}, {pipeline_mode = #tpu.pipeline_mode<synchronous>, transform_indices = @transform_7, window_bounds = array<i64: 1, 64, 512>}, {pipeline_mode = #tpu.pipeline_mode<synchronous>, transform_indices = @transform_8, window_bounds = array<i64: 1, 512>}, {pipeline_mode = #tpu.pipeline_mode<synchronous>, transform_indices = @transform_9, window_bounds = array<i64: 512, 128>}, {pipeline_mode = #tpu.pipeline_mode<synchronous>, transform_indices = @transform_10, window_bounds = array<i64: 1, 128>}, {transform_indices = @transform_11, window_bounds = array<i64: 1, 1, 128>}]} {
    %c0 = arith.constant 0 : index
    %c0_0 = arith.constant 0 : index
    %c0_1 = arith.constant 0 : index
    %0 = vector.load %arg1[%c0, %c0_0, %c0_1] : memref<1x64x256xbf16, #tpu.memory_space<vmem>>, vector<1x64x256xbf16>
    %1 = vector.shape_cast %0 : vector<1x64x256xbf16> to vector<64x256xbf16>
    %c0_2 = arith.constant 0 : index
    %c0_3 = arith.constant 0 : index
    %2 = vector.load %arg2[%c0_2, %c0_3] : memref<256x32xbf16, #tpu.memory_space<vmem>>, vector<256x32xbf16>
    %cst = arith.constant dense<0.000000e+00> : vector<64x32xf32>
    %3 = tpu.matmul %1, %2, %cst {dimension_numbers = #tpu.dot_dimension_numbers<[1], [0], [0], [1], [0, 0, 1, 1], [], []>} : vector<64x256xbf16>, vector<256x32xbf16>, vector<64x32xf32> -> vector<64x32xf32>
    %c0_4 = arith.constant 0 : index
    %c0_5 = arith.constant 0 : index
    %4 = vector.load %arg3[%c0_4, %c0_5] : memref<1x32xf32, #tpu.memory_space<vmem>>, vector<1x32xf32>
    %5 = vector.broadcast %4 : vector<1x32xf32> to vector<64x32xf32>
    %6 = arith.addf %3, %5 : vector<64x32xf32>
    %cst_6 = arith.constant 0.000000e+00 : f32
    %7 = vector.broadcast %cst_6 : f32 to vector<64x32xf32>
    %8 = arith.maximumf %6, %7 : vector<64x32xf32>
    %cst_7 = arith.constant 0.000000e+00 : f32
    %9 = vector.broadcast %cst_7 : f32 to vector<9x64xf32>
    %10 = vector.extract_strided_slice %8 {offsets = [0, 0], sizes = [3, 32], strides = [1, 1]} : vector<64x32xf32> to vector<3x32xf32>
    %11 = vector.extract_strided_slice %8 {offsets = [4, 0], sizes = [3, 32], strides = [1, 1]} : vector<64x32xf32> to vector<3x32xf32>
    %12 = vector.extract_strided_slice %8 {offsets = [8, 0], sizes = [3, 32], strides = [1, 1]} : vector<64x32xf32> to vector<3x32xf32>
    %13 = tpu.concatenate %10, %11, %12 in 0 : vector<3x32xf32>, vector<3x32xf32>, vector<3x32xf32> -> vector<9x32xf32>
    %14 = arith.truncf %13 : vector<9x32xf32> to vector<9x32xbf16>
    %c0_8 = arith.constant 0 : index
    %c0_9 = arith.constant 0 : index
    %c0_10 = arith.constant 0 : index
    %15 = vector.load %arg4[%c0_8, %c0_9, %c0_10] : memref<16x32x64xbf16, #tpu.memory_space<vmem>>, vector<1x32x64xbf16>
    %16 = vector.shape_cast %15 : vector<1x32x64xbf16> to vector<32x64xbf16>
    %cst_11 = arith.constant dense<0.000000e+00> : vector<9x64xf32>
    %17 = tpu.matmul %14, %16, %cst_11 {dimension_numbers = #tpu.dot_dimension_numbers<[1], [0], [0], [1], [0, 0, 1, 1], [], []>} : vector<9x32xbf16>, vector<32x64xbf16>, vector<9x64xf32> -> vector<9x64xf32>
    %18 = arith.addf %9, %17 : vector<9x64xf32>
    %19 = vector.extract_strided_slice %8 {offsets = [16, 0], sizes = [3, 32], strides = [1, 1]} : vector<64x32xf32> to vector<3x32xf32>
    %20 = vector.extract_strided_slice %8 {offsets = [20, 0], sizes = [3, 32], strides = [1, 1]} : vector<64x32xf32> to vector<3x32xf32>
    %21 = vector.extract_strided_slice %8 {offsets = [24, 0], sizes = [3, 32], strides = [1, 1]} : vector<64x32xf32> to vector<3x32xf32>
    %22 = tpu.concatenate %19, %20, %21 in 0 : vector<3x32xf32>, vector<3x32xf32>, vector<3x32xf32> -> vector<9x32xf32>
    %23 = arith.truncf %22 : vector<9x32xf32> to vector<9x32xbf16>
    %c1 = arith.constant 1 : index
    %c0_12 = arith.constant 0 : index
    %c0_13 = arith.constant 0 : index
    %24 = vector.load %arg4[%c1, %c0_12, %c0_13] : memref<16x32x64xbf16, #tpu.memory_space<vmem>>, vector<1x32x64xbf16>
    %25 = vector.shape_cast %24 : vector<1x32x64xbf16> to vector<32x64xbf16>
    %cst_14 = arith.constant dense<0.000000e+00> : vector<9x64xf32>
    %26 = tpu.matmul %23, %25, %cst_14 {dimension_numbers = #tpu.dot_dimension_numbers<[1], [0], [0], [1], [0, 0, 1, 1], [], []>} : vector<9x32xbf16>, vector<32x64xbf16>, vector<9x64xf32> -> vector<9x64xf32>
    %27 = arith.addf %18, %26 : vector<9x64xf32>
    %28 = vector.extract_strided_slice %8 {offsets = [1, 0], sizes = [3, 32], strides = [1, 1]} : vector<64x32xf32> to vector<3x32xf32>
    %29 = vector.extract_strided_slice %8 {offsets = [5, 0], sizes = [3, 32], strides = [1, 1]} : vector<64x32xf32> to vector<3x32xf32>
    %30 = vector.extract_strided_slice %8 {offsets = [9, 0], sizes = [3, 32], strides = [1, 1]} : vector<64x32xf32> to vector<3x32xf32>
    %31 = tpu.concatenate %28, %29, %30 in 0 : vector<3x32xf32>, vector<3x32xf32>, vector<3x32xf32> -> vector<9x32xf32>
    %32 = arith.truncf %31 : vector<9x32xf32> to vector<9x32xbf16>
    %c2 = arith.constant 2 : index
    %c0_15 = arith.constant 0 : index
    %c0_16 = arith.constant 0 : index
    %33 = vector.load %arg4[%c2, %c0_15, %c0_16] : memref<16x32x64xbf16, #tpu.memory_space<vmem>>, vector<1x32x64xbf16>
    %34 = vector.shape_cast %33 : vector<1x32x64xbf16> to vector<32x64xbf16>
    %cst_17 = arith.constant dense<0.000000e+00> : vector<9x64xf32>
    %35 = tpu.matmul %32, %34, %cst_17 {dimension_numbers = #tpu.dot_dimension_numbers<[1], [0], [0], [1], [0, 0, 1, 1], [], []>} : vector<9x32xbf16>, vector<32x64xbf16>, vector<9x64xf32> -> vector<9x64xf32>
    %36 = arith.addf %27, %35 : vector<9x64xf32>
    %37 = vector.extract_strided_slice %8 {offsets = [17, 0], sizes = [3, 32], strides = [1, 1]} : vector<64x32xf32> to vector<3x32xf32>
    %38 = vector.extract_strided_slice %8 {offsets = [21, 0], sizes = [3, 32], strides = [1, 1]} : vector<64x32xf32> to vector<3x32xf32>
    %39 = vector.extract_strided_slice %8 {offsets = [25, 0], sizes = [3, 32], strides = [1, 1]} : vector<64x32xf32> to vector<3x32xf32>
    %40 = tpu.concatenate %37, %38, %39 in 0 : vector<3x32xf32>, vector<3x32xf32>, vector<3x32xf32> -> vector<9x32xf32>
    %41 = arith.truncf %40 : vector<9x32xf32> to vector<9x32xbf16>
    %c3 = arith.constant 3 : index
    %c0_18 = arith.constant 0 : index
    %c0_19 = arith.constant 0 : index
    %42 = vector.load %arg4[%c3, %c0_18, %c0_19] : memref<16x32x64xbf16, #tpu.memory_space<vmem>>, vector<1x32x64xbf16>
    %43 = vector.shape_cast %42 : vector<1x32x64xbf16> to vector<32x64xbf16>
    %cst_20 = arith.constant dense<0.000000e+00> : vector<9x64xf32>
    %44 = tpu.matmul %41, %43, %cst_20 {dimension_numbers = #tpu.dot_dimension_numbers<[1], [0], [0], [1], [0, 0, 1, 1], [], []>} : vector<9x32xbf16>, vector<32x64xbf16>, vector<9x64xf32> -> vector<9x64xf32>
    %45 = arith.addf %36, %44 : vector<9x64xf32>
    %46 = vector.extract_strided_slice %8 {offsets = [32, 0], sizes = [3, 32], strides = [1, 1]} : vector<64x32xf32> to vector<3x32xf32>
    %47 = vector.extract_strided_slice %8 {offsets = [36, 0], sizes = [3, 32], strides = [1, 1]} : vector<64x32xf32> to vector<3x32xf32>
    %48 = vector.extract_strided_slice %8 {offsets = [40, 0], sizes = [3, 32], strides = [1, 1]} : vector<64x32xf32> to vector<3x32xf32>
    %49 = tpu.concatenate %46, %47, %48 in 0 : vector<3x32xf32>, vector<3x32xf32>, vector<3x32xf32> -> vector<9x32xf32>
    %50 = arith.truncf %49 : vector<9x32xf32> to vector<9x32xbf16>
    %c4 = arith.constant 4 : index
    %c0_21 = arith.constant 0 : index
    %c0_22 = arith.constant 0 : index
    %51 = vector.load %arg4[%c4, %c0_21, %c0_22] : memref<16x32x64xbf16, #tpu.memory_space<vmem>>, vector<1x32x64xbf16>
    %52 = vector.shape_cast %51 : vector<1x32x64xbf16> to vector<32x64xbf16>
    %cst_23 = arith.constant dense<0.000000e+00> : vector<9x64xf32>
    %53 = tpu.matmul %50, %52, %cst_23 {dimension_numbers = #tpu.dot_dimension_numbers<[1], [0], [0], [1], [0, 0, 1, 1], [], []>} : vector<9x32xbf16>, vector<32x64xbf16>, vector<9x64xf32> -> vector<9x64xf32>
    %54 = arith.addf %45, %53 : vector<9x64xf32>
    %55 = vector.extract_strided_slice %8 {offsets = [48, 0], sizes = [3, 32], strides = [1, 1]} : vector<64x32xf32> to vector<3x32xf32>
    %56 = vector.extract_strided_slice %8 {offsets = [52, 0], sizes = [3, 32], strides = [1, 1]} : vector<64x32xf32> to vector<3x32xf32>
    %57 = vector.extract_strided_slice %8 {offsets = [56, 0], sizes = [3, 32], strides = [1, 1]} : vector<64x32xf32> to vector<3x32xf32>
    %58 = tpu.concatenate %55, %56, %57 in 0 : vector<3x32xf32>, vector<3x32xf32>, vector<3x32xf32> -> vector<9x32xf32>
    %59 = arith.truncf %58 : vector<9x32xf32> to vector<9x32xbf16>
    %c5 = arith.constant 5 : index
    %c0_24 = arith.constant 0 : index
    %c0_25 = arith.constant 0 : index
    %60 = vector.load %arg4[%c5, %c0_24, %c0_25] : memref<16x32x64xbf16, #tpu.memory_space<vmem>>, vector<1x32x64xbf16>
    %61 = vector.shape_cast %60 : vector<1x32x64xbf16> to vector<32x64xbf16>
    %cst_26 = arith.constant dense<0.000000e+00> : vector<9x64xf32>
    %62 = tpu.matmul %59, %61, %cst_26 {dimension_numbers = #tpu.dot_dimension_numbers<[1], [0], [0], [1], [0, 0, 1, 1], [], []>} : vector<9x32xbf16>, vector<32x64xbf16>, vector<9x64xf32> -> vector<9x64xf32>
    %63 = arith.addf %54, %62 : vector<9x64xf32>
    %64 = vector.extract_strided_slice %8 {offsets = [33, 0], sizes = [3, 32], strides = [1, 1]} : vector<64x32xf32> to vector<3x32xf32>
    %65 = vector.extract_strided_slice %8 {offsets = [37, 0], sizes = [3, 32], strides = [1, 1]} : vector<64x32xf32> to vector<3x32xf32>
    %66 = vector.extract_strided_slice %8 {offsets = [41, 0], sizes = [3, 32], strides = [1, 1]} : vector<64x32xf32> to vector<3x32xf32>
    %67 = tpu.concatenate %64, %65, %66 in 0 : vector<3x32xf32>, vector<3x32xf32>, vector<3x32xf32> -> vector<9x32xf32>
    %68 = arith.truncf %67 : vector<9x32xf32> to vector<9x32xbf16>
    %c6 = arith.constant 6 : index
    %c0_27 = arith.constant 0 : index
    %c0_28 = arith.constant 0 : index
    %69 = vector.load %arg4[%c6, %c0_27, %c0_28] : memref<16x32x64xbf16, #tpu.memory_space<vmem>>, vector<1x32x64xbf16>
    %70 = vector.shape_cast %69 : vector<1x32x64xbf16> to vector<32x64xbf16>
    %cst_29 = arith.constant dense<0.000000e+00> : vector<9x64xf32>
    %71 = tpu.matmul %68, %70, %cst_29 {dimension_numbers = #tpu.dot_dimension_numbers<[1], [0], [0], [1], [0, 0, 1, 1], [], []>} : vector<9x32xbf16>, vector<32x64xbf16>, vector<9x64xf32> -> vector<9x64xf32>
    %72 = arith.addf %63, %71 : vector<9x64xf32>
    %73 = vector.extract_strided_slice %8 {offsets = [49, 0], sizes = [3, 32], strides = [1, 1]} : vector<64x32xf32> to vector<3x32xf32>
    %74 = vector.extract_strided_slice %8 {offsets = [53, 0], sizes = [3, 32], strides = [1, 1]} : vector<64x32xf32> to vector<3x32xf32>
    %75 = vector.extract_strided_slice %8 {offsets = [57, 0], sizes = [3, 32], strides = [1, 1]} : vector<64x32xf32> to vector<3x32xf32>
    %76 = tpu.concatenate %73, %74, %75 in 0 : vector<3x32xf32>, vector<3x32xf32>, vector<3x32xf32> -> vector<9x32xf32>
    %77 = arith.truncf %76 : vector<9x32xf32> to vector<9x32xbf16>
    %c7 = arith.constant 7 : index
    %c0_30 = arith.constant 0 : index
    %c0_31 = arith.constant 0 : index
    %78 = vector.load %arg4[%c7, %c0_30, %c0_31] : memref<16x32x64xbf16, #tpu.memory_space<vmem>>, vector<1x32x64xbf16>
    %79 = vector.shape_cast %78 : vector<1x32x64xbf16> to vector<32x64xbf16>
    %cst_32 = arith.constant dense<0.000000e+00> : vector<9x64xf32>
    %80 = tpu.matmul %77, %79, %cst_32 {dimension_numbers = #tpu.dot_dimension_numbers<[1], [0], [0], [1], [0, 0, 1, 1], [], []>} : vector<9x32xbf16>, vector<32x64xbf16>, vector<9x64xf32> -> vector<9x64xf32>
    %81 = arith.addf %72, %80 : vector<9x64xf32>
    %82 = vector.extract_strided_slice %8 {offsets = [4, 0], sizes = [3, 32], strides = [1, 1]} : vector<64x32xf32> to vector<3x32xf32>
    %83 = vector.extract_strided_slice %8 {offsets = [8, 0], sizes = [3, 32], strides = [1, 1]} : vector<64x32xf32> to vector<3x32xf32>
    %84 = vector.extract_strided_slice %8 {offsets = [12, 0], sizes = [3, 32], strides = [1, 1]} : vector<64x32xf32> to vector<3x32xf32>
    %85 = tpu.concatenate %82, %83, %84 in 0 : vector<3x32xf32>, vector<3x32xf32>, vector<3x32xf32> -> vector<9x32xf32>
    %86 = arith.truncf %85 : vector<9x32xf32> to vector<9x32xbf16>
    %c8 = arith.constant 8 : index
    %c0_33 = arith.constant 0 : index
    %c0_34 = arith.constant 0 : index
    %87 = vector.load %arg4[%c8, %c0_33, %c0_34] : memref<16x32x64xbf16, #tpu.memory_space<vmem>>, vector<1x32x64xbf16>
    %88 = vector.shape_cast %87 : vector<1x32x64xbf16> to vector<32x64xbf16>
    %cst_35 = arith.constant dense<0.000000e+00> : vector<9x64xf32>
    %89 = tpu.matmul %86, %88, %cst_35 {dimension_numbers = #tpu.dot_dimension_numbers<[1], [0], [0], [1], [0, 0, 1, 1], [], []>} : vector<9x32xbf16>, vector<32x64xbf16>, vector<9x64xf32> -> vector<9x64xf32>
    %90 = arith.addf %81, %89 : vector<9x64xf32>
    %91 = vector.extract_strided_slice %8 {offsets = [20, 0], sizes = [3, 32], strides = [1, 1]} : vector<64x32xf32> to vector<3x32xf32>
    %92 = vector.extract_strided_slice %8 {offsets = [24, 0], sizes = [3, 32], strides = [1, 1]} : vector<64x32xf32> to vector<3x32xf32>
    %93 = vector.extract_strided_slice %8 {offsets = [28, 0], sizes = [3, 32], strides = [1, 1]} : vector<64x32xf32> to vector<3x32xf32>
    %94 = tpu.concatenate %91, %92, %93 in 0 : vector<3x32xf32>, vector<3x32xf32>, vector<3x32xf32> -> vector<9x32xf32>
    %95 = arith.truncf %94 : vector<9x32xf32> to vector<9x32xbf16>
    %c9 = arith.constant 9 : index
    %c0_36 = arith.constant 0 : index
    %c0_37 = arith.constant 0 : index
    %96 = vector.load %arg4[%c9, %c0_36, %c0_37] : memref<16x32x64xbf16, #tpu.memory_space<vmem>>, vector<1x32x64xbf16>
    %97 = vector.shape_cast %96 : vector<1x32x64xbf16> to vector<32x64xbf16>
    %cst_38 = arith.constant dense<0.000000e+00> : vector<9x64xf32>
    %98 = tpu.matmul %95, %97, %cst_38 {dimension_numbers = #tpu.dot_dimension_numbers<[1], [0], [0], [1], [0, 0, 1, 1], [], []>} : vector<9x32xbf16>, vector<32x64xbf16>, vector<9x64xf32> -> vector<9x64xf32>
    %99 = arith.addf %90, %98 : vector<9x64xf32>
    %100 = vector.extract_strided_slice %8 {offsets = [5, 0], sizes = [3, 32], strides = [1, 1]} : vector<64x32xf32> to vector<3x32xf32>
    %101 = vector.extract_strided_slice %8 {offsets = [9, 0], sizes = [3, 32], strides = [1, 1]} : vector<64x32xf32> to vector<3x32xf32>
    %102 = vector.extract_strided_slice %8 {offsets = [13, 0], sizes = [3, 32], strides = [1, 1]} : vector<64x32xf32> to vector<3x32xf32>
    %103 = tpu.concatenate %100, %101, %102 in 0 : vector<3x32xf32>, vector<3x32xf32>, vector<3x32xf32> -> vector<9x32xf32>
    %104 = arith.truncf %103 : vector<9x32xf32> to vector<9x32xbf16>
    %c10 = arith.constant 10 : index
    %c0_39 = arith.constant 0 : index
    %c0_40 = arith.constant 0 : index
    %105 = vector.load %arg4[%c10, %c0_39, %c0_40] : memref<16x32x64xbf16, #tpu.memory_space<vmem>>, vector<1x32x64xbf16>
    %106 = vector.shape_cast %105 : vector<1x32x64xbf16> to vector<32x64xbf16>
    %cst_41 = arith.constant dense<0.000000e+00> : vector<9x64xf32>
    %107 = tpu.matmul %104, %106, %cst_41 {dimension_numbers = #tpu.dot_dimension_numbers<[1], [0], [0], [1], [0, 0, 1, 1], [], []>} : vector<9x32xbf16>, vector<32x64xbf16>, vector<9x64xf32> -> vector<9x64xf32>
    %108 = arith.addf %99, %107 : vector<9x64xf32>
    %109 = vector.extract_strided_slice %8 {offsets = [21, 0], sizes = [3, 32], strides = [1, 1]} : vector<64x32xf32> to vector<3x32xf32>
    %110 = vector.extract_strided_slice %8 {offsets = [25, 0], sizes = [3, 32], strides = [1, 1]} : vector<64x32xf32> to vector<3x32xf32>
    %111 = vector.extract_strided_slice %8 {offsets = [29, 0], sizes = [3, 32], strides = [1, 1]} : vector<64x32xf32> to vector<3x32xf32>
    %112 = tpu.concatenate %109, %110, %111 in 0 : vector<3x32xf32>, vector<3x32xf32>, vector<3x32xf32> -> vector<9x32xf32>
    %113 = arith.truncf %112 : vector<9x32xf32> to vector<9x32xbf16>
    %c11 = arith.constant 11 : index
    %c0_42 = arith.constant 0 : index
    %c0_43 = arith.constant 0 : index
    %114 = vector.load %arg4[%c11, %c0_42, %c0_43] : memref<16x32x64xbf16, #tpu.memory_space<vmem>>, vector<1x32x64xbf16>
    %115 = vector.shape_cast %114 : vector<1x32x64xbf16> to vector<32x64xbf16>
    %cst_44 = arith.constant dense<0.000000e+00> : vector<9x64xf32>
    %116 = tpu.matmul %113, %115, %cst_44 {dimension_numbers = #tpu.dot_dimension_numbers<[1], [0], [0], [1], [0, 0, 1, 1], [], []>} : vector<9x32xbf16>, vector<32x64xbf16>, vector<9x64xf32> -> vector<9x64xf32>
    %117 = arith.addf %108, %116 : vector<9x64xf32>
    %118 = vector.extract_strided_slice %8 {offsets = [36, 0], sizes = [3, 32], strides = [1, 1]} : vector<64x32xf32> to vector<3x32xf32>
    %119 = vector.extract_strided_slice %8 {offsets = [40, 0], sizes = [3, 32], strides = [1, 1]} : vector<64x32xf32> to vector<3x32xf32>
    %120 = vector.extract_strided_slice %8 {offsets = [44, 0], sizes = [3, 32], strides = [1, 1]} : vector<64x32xf32> to vector<3x32xf32>
    %121 = tpu.concatenate %118, %119, %120 in 0 : vector<3x32xf32>, vector<3x32xf32>, vector<3x32xf32> -> vector<9x32xf32>
    %122 = arith.truncf %121 : vector<9x32xf32> to vector<9x32xbf16>
    %c12 = arith.constant 12 : index
    %c0_45 = arith.constant 0 : index
    %c0_46 = arith.constant 0 : index
    %123 = vector.load %arg4[%c12, %c0_45, %c0_46] : memref<16x32x64xbf16, #tpu.memory_space<vmem>>, vector<1x32x64xbf16>
    %124 = vector.shape_cast %123 : vector<1x32x64xbf16> to vector<32x64xbf16>
    %cst_47 = arith.constant dense<0.000000e+00> : vector<9x64xf32>
    %125 = tpu.matmul %122, %124, %cst_47 {dimension_numbers = #tpu.dot_dimension_numbers<[1], [0], [0], [1], [0, 0, 1, 1], [], []>} : vector<9x32xbf16>, vector<32x64xbf16>, vector<9x64xf32> -> vector<9x64xf32>
    %126 = arith.addf %117, %125 : vector<9x64xf32>
    %127 = vector.extract_strided_slice %8 {offsets = [52, 0], sizes = [3, 32], strides = [1, 1]} : vector<64x32xf32> to vector<3x32xf32>
    %128 = vector.extract_strided_slice %8 {offsets = [56, 0], sizes = [3, 32], strides = [1, 1]} : vector<64x32xf32> to vector<3x32xf32>
    %129 = vector.extract_strided_slice %8 {offsets = [60, 0], sizes = [3, 32], strides = [1, 1]} : vector<64x32xf32> to vector<3x32xf32>
    %130 = tpu.concatenate %127, %128, %129 in 0 : vector<3x32xf32>, vector<3x32xf32>, vector<3x32xf32> -> vector<9x32xf32>
    %131 = arith.truncf %130 : vector<9x32xf32> to vector<9x32xbf16>
    %c13 = arith.constant 13 : index
    %c0_48 = arith.constant 0 : index
    %c0_49 = arith.constant 0 : index
    %132 = vector.load %arg4[%c13, %c0_48, %c0_49] : memref<16x32x64xbf16, #tpu.memory_space<vmem>>, vector<1x32x64xbf16>
    %133 = vector.shape_cast %132 : vector<1x32x64xbf16> to vector<32x64xbf16>
    %cst_50 = arith.constant dense<0.000000e+00> : vector<9x64xf32>
    %134 = tpu.matmul %131, %133, %cst_50 {dimension_numbers = #tpu.dot_dimension_numbers<[1], [0], [0], [1], [0, 0, 1, 1], [], []>} : vector<9x32xbf16>, vector<32x64xbf16>, vector<9x64xf32> -> vector<9x64xf32>
    %135 = arith.addf %126, %134 : vector<9x64xf32>
    %136 = vector.extract_strided_slice %8 {offsets = [37, 0], sizes = [3, 32], strides = [1, 1]} : vector<64x32xf32> to vector<3x32xf32>
    %137 = vector.extract_strided_slice %8 {offsets = [41, 0], sizes = [3, 32], strides = [1, 1]} : vector<64x32xf32> to vector<3x32xf32>
    %138 = vector.extract_strided_slice %8 {offsets = [45, 0], sizes = [3, 32], strides = [1, 1]} : vector<64x32xf32> to vector<3x32xf32>
    %139 = tpu.concatenate %136, %137, %138 in 0 : vector<3x32xf32>, vector<3x32xf32>, vector<3x32xf32> -> vector<9x32xf32>
    %140 = arith.truncf %139 : vector<9x32xf32> to vector<9x32xbf16>
    %c14 = arith.constant 14 : index
    %c0_51 = arith.constant 0 : index
    %c0_52 = arith.constant 0 : index
    %141 = vector.load %arg4[%c14, %c0_51, %c0_52] : memref<16x32x64xbf16, #tpu.memory_space<vmem>>, vector<1x32x64xbf16>
    %142 = vector.shape_cast %141 : vector<1x32x64xbf16> to vector<32x64xbf16>
    %cst_53 = arith.constant dense<0.000000e+00> : vector<9x64xf32>
    %143 = tpu.matmul %140, %142, %cst_53 {dimension_numbers = #tpu.dot_dimension_numbers<[1], [0], [0], [1], [0, 0, 1, 1], [], []>} : vector<9x32xbf16>, vector<32x64xbf16>, vector<9x64xf32> -> vector<9x64xf32>
    %144 = arith.addf %135, %143 : vector<9x64xf32>
    %145 = vector.extract_strided_slice %8 {offsets = [53, 0], sizes = [3, 32], strides = [1, 1]} : vector<64x32xf32> to vector<3x32xf32>
    %146 = vector.extract_strided_slice %8 {offsets = [57, 0], sizes = [3, 32], strides = [1, 1]} : vector<64x32xf32> to vector<3x32xf32>
    %147 = vector.extract_strided_slice %8 {offsets = [61, 0], sizes = [3, 32], strides = [1, 1]} : vector<64x32xf32> to vector<3x32xf32>
    %148 = tpu.concatenate %145, %146, %147 in 0 : vector<3x32xf32>, vector<3x32xf32>, vector<3x32xf32> -> vector<9x32xf32>
    %149 = arith.truncf %148 : vector<9x32xf32> to vector<9x32xbf16>
    %c15 = arith.constant 15 : index
    %c0_54 = arith.constant 0 : index
    %c0_55 = arith.constant 0 : index
    %150 = vector.load %arg4[%c15, %c0_54, %c0_55] : memref<16x32x64xbf16, #tpu.memory_space<vmem>>, vector<1x32x64xbf16>
    %151 = vector.shape_cast %150 : vector<1x32x64xbf16> to vector<32x64xbf16>
    %cst_56 = arith.constant dense<0.000000e+00> : vector<9x64xf32>
    %152 = tpu.matmul %149, %151, %cst_56 {dimension_numbers = #tpu.dot_dimension_numbers<[1], [0], [0], [1], [0, 0, 1, 1], [], []>} : vector<9x32xbf16>, vector<32x64xbf16>, vector<9x64xf32> -> vector<9x64xf32>
    %153 = arith.addf %144, %152 : vector<9x64xf32>
    %c0_57 = arith.constant 0 : index
    %c0_58 = arith.constant 0 : index
    %154 = vector.load %arg5[%c0_57, %c0_58] : memref<1x64xf32, #tpu.memory_space<vmem>>, vector<1x64xf32>
    %155 = vector.broadcast %154 : vector<1x64xf32> to vector<9x64xf32>
    %156 = arith.addf %153, %155 : vector<9x64xf32>
    %cst_59 = arith.constant 0.000000e+00 : f32
    %157 = vector.broadcast %cst_59 : f32 to vector<9x64xf32>
    %158 = arith.maximumf %156, %157 : vector<9x64xf32>
    %cst_60 = arith.constant 0.000000e+00 : f32
    %159 = vector.broadcast %cst_60 : f32 to vector<1x64xf32>
    %160 = vector.extract_strided_slice %158 {offsets = [0, 0], sizes = [1, 64], strides = [1, 1]} : vector<9x64xf32> to vector<1x64xf32>
    %161 = arith.truncf %160 : vector<1x64xf32> to vector<1x64xbf16>
    %c0_61 = arith.constant 0 : index
    %c0_62 = arith.constant 0 : index
    %c0_63 = arith.constant 0 : index
    %162 = vector.load %arg6[%c0_61, %c0_62, %c0_63] : memref<9x64x64xbf16, #tpu.memory_space<vmem>>, vector<1x64x64xbf16>
    %163 = vector.shape_cast %162 : vector<1x64x64xbf16> to vector<64x64xbf16>
    %cst_64 = arith.constant dense<0.000000e+00> : vector<1x64xf32>
    %164 = tpu.matmul %161, %163, %cst_64 {dimension_numbers = #tpu.dot_dimension_numbers<[1], [0], [0], [1], [0, 0, 1, 1], [], []>} : vector<1x64xbf16>, vector<64x64xbf16>, vector<1x64xf32> -> vector<1x64xf32>
    %165 = arith.addf %159, %164 : vector<1x64xf32>
    %166 = vector.extract_strided_slice %158 {offsets = [1, 0], sizes = [1, 64], strides = [1, 1]} : vector<9x64xf32> to vector<1x64xf32>
    %167 = arith.truncf %166 : vector<1x64xf32> to vector<1x64xbf16>
    %c1_65 = arith.constant 1 : index
    %c0_66 = arith.constant 0 : index
    %c0_67 = arith.constant 0 : index
    %168 = vector.load %arg6[%c1_65, %c0_66, %c0_67] : memref<9x64x64xbf16, #tpu.memory_space<vmem>>, vector<1x64x64xbf16>
    %169 = vector.shape_cast %168 : vector<1x64x64xbf16> to vector<64x64xbf16>
    %cst_68 = arith.constant dense<0.000000e+00> : vector<1x64xf32>
    %170 = tpu.matmul %167, %169, %cst_68 {dimension_numbers = #tpu.dot_dimension_numbers<[1], [0], [0], [1], [0, 0, 1, 1], [], []>} : vector<1x64xbf16>, vector<64x64xbf16>, vector<1x64xf32> -> vector<1x64xf32>
    %171 = arith.addf %165, %170 : vector<1x64xf32>
    %172 = vector.extract_strided_slice %158 {offsets = [2, 0], sizes = [1, 64], strides = [1, 1]} : vector<9x64xf32> to vector<1x64xf32>
    %173 = arith.truncf %172 : vector<1x64xf32> to vector<1x64xbf16>
    %c2_69 = arith.constant 2 : index
    %c0_70 = arith.constant 0 : index
    %c0_71 = arith.constant 0 : index
    %174 = vector.load %arg6[%c2_69, %c0_70, %c0_71] : memref<9x64x64xbf16, #tpu.memory_space<vmem>>, vector<1x64x64xbf16>
    %175 = vector.shape_cast %174 : vector<1x64x64xbf16> to vector<64x64xbf16>
    %cst_72 = arith.constant dense<0.000000e+00> : vector<1x64xf32>
    %176 = tpu.matmul %173, %175, %cst_72 {dimension_numbers = #tpu.dot_dimension_numbers<[1], [0], [0], [1], [0, 0, 1, 1], [], []>} : vector<1x64xbf16>, vector<64x64xbf16>, vector<1x64xf32> -> vector<1x64xf32>
    %177 = arith.addf %171, %176 : vector<1x64xf32>
    %178 = vector.extract_strided_slice %158 {offsets = [3, 0], sizes = [1, 64], strides = [1, 1]} : vector<9x64xf32> to vector<1x64xf32>
    %179 = arith.truncf %178 : vector<1x64xf32> to vector<1x64xbf16>
    %c3_73 = arith.constant 3 : index
    %c0_74 = arith.constant 0 : index
    %c0_75 = arith.constant 0 : index
    %180 = vector.load %arg6[%c3_73, %c0_74, %c0_75] : memref<9x64x64xbf16, #tpu.memory_space<vmem>>, vector<1x64x64xbf16>
    %181 = vector.shape_cast %180 : vector<1x64x64xbf16> to vector<64x64xbf16>
    %cst_76 = arith.constant dense<0.000000e+00> : vector<1x64xf32>
    %182 = tpu.matmul %179, %181, %cst_76 {dimension_numbers = #tpu.dot_dimension_numbers<[1], [0], [0], [1], [0, 0, 1, 1], [], []>} : vector<1x64xbf16>, vector<64x64xbf16>, vector<1x64xf32> -> vector<1x64xf32>
    %183 = arith.addf %177, %182 : vector<1x64xf32>
    %184 = vector.extract_strided_slice %158 {offsets = [4, 0], sizes = [1, 64], strides = [1, 1]} : vector<9x64xf32> to vector<1x64xf32>
    %185 = arith.truncf %184 : vector<1x64xf32> to vector<1x64xbf16>
    %c4_77 = arith.constant 4 : index
    %c0_78 = arith.constant 0 : index
    %c0_79 = arith.constant 0 : index
    %186 = vector.load %arg6[%c4_77, %c0_78, %c0_79] : memref<9x64x64xbf16, #tpu.memory_space<vmem>>, vector<1x64x64xbf16>
    %187 = vector.shape_cast %186 : vector<1x64x64xbf16> to vector<64x64xbf16>
    %cst_80 = arith.constant dense<0.000000e+00> : vector<1x64xf32>
    %188 = tpu.matmul %185, %187, %cst_80 {dimension_numbers = #tpu.dot_dimension_numbers<[1], [0], [0], [1], [0, 0, 1, 1], [], []>} : vector<1x64xbf16>, vector<64x64xbf16>, vector<1x64xf32> -> vector<1x64xf32>
    %189 = arith.addf %183, %188 : vector<1x64xf32>
    %190 = vector.extract_strided_slice %158 {offsets = [5, 0], sizes = [1, 64], strides = [1, 1]} : vector<9x64xf32> to vector<1x64xf32>
    %191 = arith.truncf %190 : vector<1x64xf32> to vector<1x64xbf16>
    %c5_81 = arith.constant 5 : index
    %c0_82 = arith.constant 0 : index
    %c0_83 = arith.constant 0 : index
    %192 = vector.load %arg6[%c5_81, %c0_82, %c0_83] : memref<9x64x64xbf16, #tpu.memory_space<vmem>>, vector<1x64x64xbf16>
    %193 = vector.shape_cast %192 : vector<1x64x64xbf16> to vector<64x64xbf16>
    %cst_84 = arith.constant dense<0.000000e+00> : vector<1x64xf32>
    %194 = tpu.matmul %191, %193, %cst_84 {dimension_numbers = #tpu.dot_dimension_numbers<[1], [0], [0], [1], [0, 0, 1, 1], [], []>} : vector<1x64xbf16>, vector<64x64xbf16>, vector<1x64xf32> -> vector<1x64xf32>
    %195 = arith.addf %189, %194 : vector<1x64xf32>
    %196 = vector.extract_strided_slice %158 {offsets = [6, 0], sizes = [1, 64], strides = [1, 1]} : vector<9x64xf32> to vector<1x64xf32>
    %197 = arith.truncf %196 : vector<1x64xf32> to vector<1x64xbf16>
    %c6_85 = arith.constant 6 : index
    %c0_86 = arith.constant 0 : index
    %c0_87 = arith.constant 0 : index
    %198 = vector.load %arg6[%c6_85, %c0_86, %c0_87] : memref<9x64x64xbf16, #tpu.memory_space<vmem>>, vector<1x64x64xbf16>
    %199 = vector.shape_cast %198 : vector<1x64x64xbf16> to vector<64x64xbf16>
    %cst_88 = arith.constant dense<0.000000e+00> : vector<1x64xf32>
    %200 = tpu.matmul %197, %199, %cst_88 {dimension_numbers = #tpu.dot_dimension_numbers<[1], [0], [0], [1], [0, 0, 1, 1], [], []>} : vector<1x64xbf16>, vector<64x64xbf16>, vector<1x64xf32> -> vector<1x64xf32>
    %201 = arith.addf %195, %200 : vector<1x64xf32>
    %202 = vector.extract_strided_slice %158 {offsets = [7, 0], sizes = [1, 64], strides = [1, 1]} : vector<9x64xf32> to vector<1x64xf32>
    %203 = arith.truncf %202 : vector<1x64xf32> to vector<1x64xbf16>
    %c7_89 = arith.constant 7 : index
    %c0_90 = arith.constant 0 : index
    %c0_91 = arith.constant 0 : index
    %204 = vector.load %arg6[%c7_89, %c0_90, %c0_91] : memref<9x64x64xbf16, #tpu.memory_space<vmem>>, vector<1x64x64xbf16>
    %205 = vector.shape_cast %204 : vector<1x64x64xbf16> to vector<64x64xbf16>
    %cst_92 = arith.constant dense<0.000000e+00> : vector<1x64xf32>
    %206 = tpu.matmul %203, %205, %cst_92 {dimension_numbers = #tpu.dot_dimension_numbers<[1], [0], [0], [1], [0, 0, 1, 1], [], []>} : vector<1x64xbf16>, vector<64x64xbf16>, vector<1x64xf32> -> vector<1x64xf32>
    %207 = arith.addf %201, %206 : vector<1x64xf32>
    %208 = vector.extract_strided_slice %158 {offsets = [8, 0], sizes = [1, 64], strides = [1, 1]} : vector<9x64xf32> to vector<1x64xf32>
    %209 = arith.truncf %208 : vector<1x64xf32> to vector<1x64xbf16>
    %c8_93 = arith.constant 8 : index
    %c0_94 = arith.constant 0 : index
    %c0_95 = arith.constant 0 : index
    %210 = vector.load %arg6[%c8_93, %c0_94, %c0_95] : memref<9x64x64xbf16, #tpu.memory_space<vmem>>, vector<1x64x64xbf16>
    %211 = vector.shape_cast %210 : vector<1x64x64xbf16> to vector<64x64xbf16>
    %cst_96 = arith.constant dense<0.000000e+00> : vector<1x64xf32>
    %212 = tpu.matmul %209, %211, %cst_96 {dimension_numbers = #tpu.dot_dimension_numbers<[1], [0], [0], [1], [0, 0, 1, 1], [], []>} : vector<1x64xbf16>, vector<64x64xbf16>, vector<1x64xf32> -> vector<1x64xf32>
    %213 = arith.addf %207, %212 : vector<1x64xf32>
    %c0_97 = arith.constant 0 : index
    %c0_98 = arith.constant 0 : index
    %214 = vector.load %arg7[%c0_97, %c0_98] : memref<1x64xf32, #tpu.memory_space<vmem>>, vector<1x64xf32>
    %215 = arith.addf %213, %214 : vector<1x64xf32>
    %cst_99 = arith.constant 0.000000e+00 : f32
    %216 = vector.broadcast %cst_99 : f32 to vector<1x64xf32>
    %217 = arith.maximumf %215, %216 : vector<1x64xf32>
    %cst_100 = arith.constant 0.000000e+00 : f32
    %218 = vector.broadcast %cst_100 : f32 to vector<1x512xf32>
    %219 = arith.truncf %217 : vector<1x64xf32> to vector<1x64xbf16>
    %c0_101 = arith.constant 0 : index
    %c0_102 = arith.constant 0 : index
    %c0_103 = arith.constant 0 : index
    %220 = vector.load %arg8[%c0_101, %c0_102, %c0_103] : memref<1x64x512xbf16, #tpu.memory_space<vmem>>, vector<1x64x512xbf16>
    %221 = vector.shape_cast %220 : vector<1x64x512xbf16> to vector<64x512xbf16>
    %cst_104 = arith.constant dense<0.000000e+00> : vector<1x512xf32>
    %222 = tpu.matmul %219, %221, %cst_104 {dimension_numbers = #tpu.dot_dimension_numbers<[1], [0], [0], [1], [0, 0, 1, 1], [], []>} : vector<1x64xbf16>, vector<64x512xbf16>, vector<1x512xf32> -> vector<1x512xf32>
    %223 = arith.addf %218, %222 : vector<1x512xf32>
    %c0_105 = arith.constant 0 : index
    %c0_106 = arith.constant 0 : index
    %224 = vector.load %arg9[%c0_105, %c0_106] : memref<1x512xf32, #tpu.memory_space<vmem>>, vector<1x512xf32>
    %225 = arith.addf %223, %224 : vector<1x512xf32>
    %cst_107 = arith.constant 0.000000e+00 : f32
    %226 = vector.broadcast %cst_107 : f32 to vector<1x512xf32>
    %227 = arith.maximumf %225, %226 : vector<1x512xf32>
    %228 = arith.truncf %227 : vector<1x512xf32> to vector<1x512xbf16>
    %c0_108 = arith.constant 0 : index
    %c0_109 = arith.constant 0 : index
    %229 = vector.load %arg10[%c0_108, %c0_109] : memref<512x128xbf16, #tpu.memory_space<vmem>>, vector<512x128xbf16>
    %cst_110 = arith.constant dense<0.000000e+00> : vector<1x128xf32>
    %230 = tpu.matmul %228, %229, %cst_110 {dimension_numbers = #tpu.dot_dimension_numbers<[1], [0], [0], [1], [0, 0, 1, 1], [], []>} : vector<1x512xbf16>, vector<512x128xbf16>, vector<1x128xf32> -> vector<1x128xf32>
    %c0_111 = arith.constant 0 : index
    %c0_112 = arith.constant 0 : index
    %231 = vector.load %arg11[%c0_111, %c0_112] : memref<1x128xf32, #tpu.memory_space<vmem>>, vector<1x128xf32>
    %232 = arith.addf %230, %231 : vector<1x128xf32>
    %c0_113 = arith.constant 0 : index
    %c0_114 = arith.constant 0 : index
    %c0_115 = arith.constant 0 : index
    %233 = vector.load %arg12[%c0_113, %c0_114, %c0_115] : memref<1x1x128xf32, #tpu.memory_space<vmem>>, vector<1x1x128xf32>
    %234 = vector.shape_cast %233 : vector<1x1x128xf32> to vector<1x128xf32>
    %235 = vector.shape_cast %232 : vector<1x128xf32> to vector<1x1x128xf32>
    tpu.vector_store %arg12[%c0_113, %c0_114, %c0_115], %235 {strides = array<i32>} : memref<1x1x128xf32, #tpu.memory_space<vmem>>, vector<1x1x128xf32>,
    return
  }
  func.func @transform_0(%arg0: i32) -> (i32, i32, i32) {
    %c0_i32 = arith.constant 0 : i32
    %c0_i32_0 = arith.constant 0 : i32
    %c0_i32_1 = arith.constant 0 : i32
    return %arg0, %c0_i32, %c0_i32_0 : i32, i32, i32
  }
  func.func @transform_1(%arg0: i32) -> (i32, i32) {
    %c0_i32 = arith.constant 0 : i32
    %c0_i32_0 = arith.constant 0 : i32
    %c0_i32_1 = arith.constant 0 : i32
    return %c0_i32, %c0_i32_0 : i32, i32
  }
  func.func @transform_2(%arg0: i32) -> (i32, i32) {
    %c0_i32 = arith.constant 0 : i32
    %c0_i32_0 = arith.constant 0 : i32
    %c0_i32_1 = arith.constant 0 : i32
    return %c0_i32, %c0_i32_0 : i32, i32
  }
  func.func @transform_3(%arg0: i32) -> (i32, i32, i32) {
    %c0_i32 = arith.constant 0 : i32
    %c0_i32_0 = arith.constant 0 : i32
    %c0_i32_1 = arith.constant 0 : i32
    %c0_i32_2 = arith.constant 0 : i32
    return %c0_i32, %c0_i32_0, %c0_i32_1 : i32, i32, i32
  }
  func.func @transform_4(%arg0: i32) -> (i32, i32) {
    %c0_i32 = arith.constant 0 : i32
    %c0_i32_0 = arith.constant 0 : i32
    %c0_i32_1 = arith.constant 0 : i32
    return %c0_i32, %c0_i32_0 : i32, i32
  }
  func.func @transform_5(%arg0: i32) -> (i32, i32, i32) {
    %c0_i32 = arith.constant 0 : i32
    %c0_i32_0 = arith.constant 0 : i32
    %c0_i32_1 = arith.constant 0 : i32
    %c0_i32_2 = arith.constant 0 : i32
    return %c0_i32, %c0_i32_0, %c0_i32_1 : i32, i32, i32
  }
  func.func @transform_6(%arg0: i32) -> (i32, i32) {
    %c0_i32 = arith.constant 0 : i32
    %c0_i32_0 = arith.constant 0 : i32
    %c0_i32_1 = arith.constant 0 : i32
    return %c0_i32, %c0_i32_0 : i32, i32
  }
  func.func @transform_7(%arg0: i32) -> (i32, i32, i32) {
    %c0_i32 = arith.constant 0 : i32
    %c0_i32_0 = arith.constant 0 : i32
    %c0_i32_1 = arith.constant 0 : i32
    %c0_i32_2 = arith.constant 0 : i32
    return %c0_i32, %c0_i32_0, %c0_i32_1 : i32, i32, i32
  }
  func.func @transform_8(%arg0: i32) -> (i32, i32) {
    %c0_i32 = arith.constant 0 : i32
    %c0_i32_0 = arith.constant 0 : i32
    %c0_i32_1 = arith.constant 0 : i32
    return %c0_i32, %c0_i32_0 : i32, i32
  }
  func.func @transform_9(%arg0: i32) -> (i32, i32) {
    %c0_i32 = arith.constant 0 : i32
    %c0_i32_0 = arith.constant 0 : i32
    %c0_i32_1 = arith.constant 0 : i32
    return %c0_i32, %c0_i32_0 : i32, i32
  }
  func.func @transform_10(%arg0: i32) -> (i32, i32) {
    %c0_i32 = arith.constant 0 : i32
    %c0_i32_0 = arith.constant 0 : i32
    %c0_i32_1 = arith.constant 0 : i32
    return %c0_i32, %c0_i32_0 : i32, i32
  }
  func.func @transform_11(%arg0: i32) -> (i32, i32, i32) {
    %c0_i32 = arith.constant 0 : i32
    %c0_i32_0 = arith.constant 0 : i32
    %c0_i32_1 = arith.constant 0 : i32
    return %arg0, %c0_i32, %c0_i32_0 : i32, i32, i32
  }
}

</mosaic_0001>

<bundles_post_ra>
// kernel: dqn_nature_forward.1
= control target key start
LH: loop header
LB: loop body
LE: loop exit
PB: predicated region body
PF: predicated region fallthrough
CT: control target
= control target key end

     0   :  { %16 = vsyncpa [#allocation3], 0  ;;  %s4086_s0 = inlined_call_operand.vmem [shape: bf16[2,64,256], index: 0, kind: input, shape index: {}]   ;;  %s4087_s1 = inlined_call_operand.vmem [shape: bf16[256,32], index: 1, kind: input, shape index: {}]   ;;  %s4088_s2 = inlined_call_operand.vmem [shape: f32[1,32], index: 2, kind: input, shape index: {}]   ;;  %s4089_s3 = inlined_call_operand.vmem [shape: bf16[16,32,64], index: 3, kind: input, shape index: {}]   ;;  %s4090_s4 = inlined_call_operand.vmem [shape: f32[1,64], index: 4, kind: input, shape index: {}]   ;;  %s4091_s5 = inlined_call_operand.vmem [shape: bf16[9,64,64], index: 5, kind: input, shape index: {}]   ;;  %s4092_s6 = inlined_call_operand.vmem [shape: f32[1,64], index: 6, kind: input, shape index: {}]   ;;  %s4093_s7 = inlined_call_operand.vmem [shape: bf16[1,64,512], index: 7, kind: input, shape index: {}]   ;;  %s4094_s8 = inlined_call_operand.vmem [shape: f32[1,512], index: 8, kind: input, shape index: {}]   ;;  %s4095_s9 = inlined_call_operand.vmem [shape: bf16[512,128], index: 9, kind: input, shape index: {}]   ;;  %s4096_s10 = inlined_call_operand.vmem [shape: f32[1,128], index: 10, kind: input, shape index: {}]   ;;  %s4097_s11 = inlined_call_operand.hbm [shape: f32[2,1,128], index: 11, kind: output, shape index: {}]  }
   0x1   :  { %18 = vsyncpa [#allocation3 + $0x1], 0  ;;  %s3378_s17 = smov 0   ;;  %s3380_s18 = smov 0  }
   0x2   :  { %s3382_s19 = smov 0   ;;  %s3384_s20 = smov 0  }
   0x3 LB: > { %4101 = sst [smem:[#allocation5_spill]] %s3312_s19  ;;  %s3399_s21 = sadd.s32 4294967295, %s3316_s20   ;;  %s3316_s20 = sphi %s3384_s20, %s4106_s20   ;;  %s3312_s19 = sphi %s3382_s19, %s4108_s19   ;;  %s3308_s18 = sphi %s3380_s18, %s4110_s18   ;;  %s3304_s17 = sphi %s3378_s17, %s4109_s17  }
   0x4   : > { %s2351_s22 = sadd.s32 4294967294, %s3316_s20   ;;  %s3403_s23 = sadd.s32 1, %s3316_s20  }
   0x5   : > { %4102 = sst [smem:[#allocation6_spill]] %s3403_s23  ;;  %s267_s24 = sadd.s32 1, %s3312_s19 }
   0x6   : > { %s264_s25 = ssub.s32 %s3316_s20, %s3403_s23  ;;  %p277_p0 = scmp.ne.s32.totalorder %s3312_s19, %s3308_s18 }
   0x7   : > { %p265_p1 = scmp.eq.s32.totalorder %s264_s25, 0  ;;  %p278_p2 = scmp.eq.s32.totalorder %s3399_s21, 1 }
   0x8   : > { %p283_p3 = scmp.ne.s32.totalorder %s3308_s18, %s3304_s17  ;;  %p284_p4 = scmp.eq.s32.totalorder %s2351_s22, 1 }
   0x9   : > { %s3414_s26 = scalar_select %p265_p1, %s3312_s19, %s267_s24  }
   0xa   : > { %p3416_p5 = por %p278_p2, %p277_p0  ;;  %p3420_p6 = por %p284_p4, %p283_p3 }
   0xb   : > { %4103 = sst [smem:[#allocation7_spill]] %s3414_s26  ;;  %p2354_p7 = scmp.ge.s32.totalorder %s3316_s20, 1 }
   0xc   : > { %p340_p8 = scmp.lt.s32.totalorder %s3316_s20, 3 }
   0xe   : > { %p341_p9 = pnand %p2354_p7, %p340_p8 }
   0xf   : > { %p379_p10 = scmp.lt.s32.totalorder (!%p341_p9), %s3399_s21, 1  ;;  %s377_s23 = sand.u32 (!%p341_p9), 1, %s3308_s18  }
  0x10   : > { %344 = sbr.rel (%p341_p9) target bundleno = 900 (0x384), region = 64  ;;  %s378_s16 = scalar_lea.vmem (!%p341_p9), [#allocation2], %s377_s23 }
  0x11   : > { %s2294_s22 = sshll.u32 (!%p341_p9), %s378_s16, 4  ;;  %s2284_s25 = scalar_lea.sflag (!%p341_p9), [#allocation3], %s377_s23  ;;  %s2295_s22 = int_to_ptr.vmem [resolvable:$true] %s2294_s22 }
  0x12   : > { %s3274_s13 = scalar_lea.hbm (!%p341_p9), %s4097_s11, 2 }
  0x15   : > { %v3088_v0 = vld [vmem:[%s4087_s1 + $0x38] sm:$0xff]  ;;  %v3087_v2 = vld [vmem:[%s4087_s1 + $0x30] sm:$0xff]  ;;  %v3086_v4 = vld [vmem:[%s4087_s1 + $0x28] sm:$0xff]  ;;  %s380_s29 = scalar_select %p379_p10, %s3399_s21, 1  ;;  %vm637_vm0 = vcmask 1042432   ;;  %vm639_vm1 = vcmask 1045504  }
  0x16   : > { %v3096_v1 = vld [vmem:[%s4087_s1 + $0x78] sm:$0xff]  ;;  %565 = vmatpush.bf16.msra.mxu0 %v3088_v0  ;;  %v3095_v3 = vld [vmem:[%s4087_s1 + $0x70] sm:$0xff]  ;;  %v3094_v5 = vld [vmem:[%s4087_s1 + $0x68] sm:$0xff]  ;;  %vm672_vm2 = vcmask 261120   ;;  %vm1386_vm3 = vcmask 523264  }
  0x17   : > { %594 = vmatpush.bf16.msra.mxu1 %v3096_v1  ;;  %v3085_v6 = vld [vmem:[%s4087_s1 + $0x20] sm:$0xff]  ;;  %v3084_v8 = vld [vmem:[%s4087_s1 + $0x18] sm:$0xff]  ;;  %v3083_v10 = vld [vmem:[%s4087_s1 + $0x10] sm:$0xff]  ;;  %s3072_s15 = sshll.u32 %s380_s29, 6 }
  0x18   : > { %v3093_v7 = vld [vmem:[%s4087_s1 + $0x60] sm:$0xff]  ;;  %v3092_v9 = vld [vmem:[%s4087_s1 + $0x58] sm:$0xff]  ;;  %v3091_v11 = vld [vmem:[%s4087_s1 + $0x50] sm:$0xff]  ;;  %s3473_s30 = scalar_lea.vmem %s4086_s0, %s3072_s15  ;;  %s2292_s15 = scalar_lea.hbm %s4097_s11, %s3399_s21 }
  0x19   : > { %v3082_v12 = vld [vmem:[%s4087_s1 + $0x8] sm:$0xff]  ;;  %v3081_v14 = vld [vmem:[%s4087_s1] sm:$0xff]  ;;  %v2367_v22 = vld [vmem:[%s3473_s30 + $0x10] sm:$0xf]  ;;  %s2296_s24 = sshll.u32 %s2292_s15, 4  ;;  %s2297_s24 = int_to_ptr.hbm [resolvable:$true] %s2296_s24 }
  0x1a   : > { %566 = vmatpush.bf16.msra.mxu0 %v3087_v2  ;;  %v3090_v13 = vld [vmem:[%s4087_s1 + $0x48] sm:$0xff]  ;;  %v3089_v15 = vld [vmem:[%s4087_s1 + $0x40] sm:$0xff]  ;;  %v3076_v23 = vld [vmem:[%s3473_s30 + $0x14] sm:$0xf0] }
  0x1b   : > { %595 = vmatpush.bf16.msra.mxu1 %v3095_v3  ;;  %v2359_v16 = vld [vmem:[%s3473_s30] sm:$0xf]  ;;  %v3074_v17 = vld [vmem:[%s3473_s30 + $0x4] sm:$0xf0]  ;;  %v3073_v18 = vld [vmem:[%s3473_s30 + $0x4] sm:$0xf]  ;;  %v2368_v26 = vor.u32 %v3076_v23, %v2367_v22 }
  0x1c   : > { %v2361_v19 = vld [vmem:[%s3473_s30 + $0x8] sm:$0xf0]  ;;  %v2360_v20 = vor.u32 %v3074_v17, %v2359_v16  ;;  %v3075_v24 = vld [vmem:[%s3473_s30 + $0x14] sm:$0xf]  ;;  %v2369_v25 = vld [vmem:[%s3473_s30 + $0x18] sm:$0xf0] }
  0x1d   : > { %v2364_v21 = vor.u32 %v3073_v18, %v2361_v19  ;;  %v2372_v27 = vor.u32 %v3075_v24, %v2369_v25  ;;  %v2375_v28 = vld [vmem:[%s3473_s30 + $0x20] sm:$0xf]  ;;  %v3078_v29 = vld [vmem:[%s3473_s30 + $0x24] sm:$0xf0]  ;;  %v3077_v30 = vld [vmem:[%s3473_s30 + $0x24] sm:$0xf] }
  0x1e   : > { %567 = vmatpush.bf16.msra.mxu0 %v3086_v4  ;;  %v2377_v31 = vld [vmem:[%s3473_s30 + $0x28] sm:$0xf0]  ;;  %v2376_v32 = vor.u32 %v3078_v29, %v2375_v28  ;;  %v2383_v34 = vld [vmem:[%s3473_s30 + $0x30] sm:$0xf]  ;;  %v3080_v35 = vld [vmem:[%s3473_s30 + $0x34] sm:$0xf0] }
  0x1f   : > { %596 = vmatpush.bf16.msra.mxu1 %v3094_v5  ;;  %v2380_v33 = vor.u32 %v3077_v30, %v2377_v31  ;;  %v3079_v36 = vld [vmem:[%s3473_s30 + $0x34] sm:$0xf]  ;;  %v2385_v37 = vld [vmem:[%s3473_s30 + $0x38] sm:$0xf0]  ;;  %v2384_v38 = vor.u32 %v3080_v35, %v2383_v34  ;;  %v3098_v40 = vld [vmem:[%s4089_s3 + $0x8] sm:$0xff]  ;;  %s3268_s30 = sshra.s32 %s2297_s24, 4  ;;  %s3269_s30 = int_to_ptr.hbm [resolvable:$true] %s3268_s30 }
  0x20   : > { %v2388_v39 = vor.u32 %v3079_v36, %v2385_v37  ;;  %711 = vmatpush.bf16.msra.mxu3 %v3098_v40  ;;  %v3097_v41 = vld [vmem:[%s4089_s3] sm:$0xff]  ;;  %v3100_v42 = vld [vmem:[%s4089_s3 + $0x18] sm:$0xff]  ;;  %v3099_v45 = vld [vmem:[%s4089_s3 + $0x10] sm:$0xff]  ;;  %s3270_s12 = scalar_lea.hbm %s3269_s30, 1  ;;  %p3275_p0 = scmp.lt.s32.totalorder %s3269_s30, %s4097_s11 }
  0x21   : > { %v3104_v43 = vld [vmem:[%s4089_s3 + $0x38] sm:$0xff]  ;;  %v3512_v44 = vld [vmem:[%s4088_s2] ss:$0 sm:$0xff]  ;;  %682 = vmatpush.bf16.msra.mxu2 %v3100_v42  ;;  %v3103_v46 = vld [vmem:[%s4089_s3 + $0x30] sm:$0xff]  ;;  %p3271_p11 = scmp.ne.s32.totalorder %s3269_s30, %s3270_s12  ;;  %p3276_p1 = scmp.lt.s32.totalorder %s3274_s13, %s3270_s12 }
  0x22   : > { %568 = vmatpush.bf16.msra.mxu0 %v3085_v6  ;;  %v3102_v55 = vld [vmem:[%s4089_s3 + $0x28] sm:$0xff]  ;;  %v3101_v2 = vld [vmem:[%s4089_s3 + $0x20] sm:$0xff] }
  0x23   : > { %597 = vmatpush.bf16.msra.mxu1 %v3093_v7  ;;  %v3122_v59 = vld [vmem:[%s4089_s3 + $0xc8] sm:$0xff]  ;;  %p3272_p12 = pnand %p3271_p11, %p3416_p5  ;;  %p3277_p2 = por %p3276_p1, %p3275_p0 }
  0x24   : > { %712 = vmatpush.bf16.msra.mxu3 %v3097_v41  ;;  %v3106_v42 = vld [vmem:[%s4089_s3 + $0x48] sm:$0xff] }
  0x25   : > { %683 = vmatpush.bf16.msra.mxu2 %v3099_v45  ;;  %p3273_p13 = pneg %p3272_p12 }
  0x26   : > { %569 = vmatpush.bf16.msra.mxu0 %v3084_v8  ;;  %v3121_v8 = vld [vmem:[%s4089_s3 + $0xc0] sm:$0xff] }
  0x27   : > { %598 = vmatpush.bf16.msra.mxu1 %v3092_v9  ;;  %p3278_p3 = pnand %p3277_p2, %p3273_p13 }
  0x28   : > { %795 = vmatpush.bf16.msrb.mxu3 %v3104_v43 }
  0x29   : > { %752 = vmatpush.bf16.msrb.mxu2 %v3102_v55  ;;  %v3112_v55 = vld [vmem:[%s4089_s3 + $0x78] sm:$0xff] }
  0x2a   : > { %570 = vmatpush.bf16.msra.mxu0 %v3083_v10 }
  0x2b   : > { %599 = vmatpush.bf16.msra.mxu1 %v3091_v11 }
  0x2c   : > { %796 = vmatpush.bf16.msrb.mxu3 %v3103_v46 }
  0x2d   : > { %753 = vmatpush.bf16.msrb.mxu2 %v3101_v2 }
  0x2e   : > { %571 = vmatpush.bf16.msra.mxu0 %v3082_v12 }
  0x2f   : > { %600 = vmatpush.bf16.msra.mxu1 %v3090_v13 }
  0x32   : > { %572 = vmatpush.bf16.msra.mxu0 %v3081_v14 }
  0x33   : > { %601 = vmatpush.bf16.msra.mxu1 %v3089_v15 }
  0x35   : > { %573 = vmatmul.bf16.vlgmr.msra.gmra.mxu0 %v2360_v20 }
  0x36   : > { %602 = vmatmul.bf16.vlgmr.msra.gmra.mxu1 %v2364_v21  ;;  %1192 = vmatpush.bf16.msrb.mxu0 %v3122_v59  ;;  %v3108_v21 = vld [vmem:[%s4089_s3 + $0x58] sm:$0xff]  ;;  %v3111_v59 = vld [vmem:[%s4089_s3 + $0x70] sm:$0xff] }
  0x3a   : > { %1193 = vmatpush.bf16.msrb.mxu0 %v3121_v8 }
  0x45   : > { %578 = vmatmul.bf16.gmra.mxu0 %v2368_v26  ;;  %v3124_v26 = vld [vmem:[%s4089_s3 + $0xd8] sm:$0xff] }
  0x46   : > { %607 = vmatmul.bf16.gmra.mxu1 %v2372_v27 }
  0x47   : > { %1237 = vmatpush.bf16.msrb.mxu1 %v3124_v26 }
  0x55   : > { %583 = vmatmul.bf16.gmra.mxu0 %v2376_v32 }
  0x56   : > { %612 = vmatmul.bf16.gmra.mxu1 %v2380_v33  ;;  %v3107_v33 = vld [vmem:[%s4089_s3 + $0x50] sm:$0xff] }
  0x65   : > { %588 = vmatmul.bf16.gmra.mxu0 %v2384_v38 }
  0x66   : > { %617 = vmatmul.bf16.gmra.mxu1 %v2388_v39  ;;  %v3123_v39 = vld [vmem:[%s4089_s3 + $0xd0] sm:$0xff] }
  0x67   : > { %1238 = vmatpush.bf16.msrb.mxu1 %v3123_v39 }
  0xb2   : > { %v574_v47 = vpop.f32.mrf.mxu0 }
  0xb3   : > { %v603_v48 = vpop.f32.mrf.mxu1  ;;  %v575_v49 = vadd.f32 %v3512_v44, %v574_v47 }
  0xb5   : > { %v604_v50 = vadd.f32 %v603_v48, %v575_v49 }
  0xb7   : > { %v3521_v51 = vmax.f32 %v604_v50, 0.0 }
  0xb9   : > { %v632_v57 = vrot.slane %v3521_v51, 1  ;;  %v981_v60 = vrot.slane %v3521_v51, 4  ;;  %v1071_v61 = vrot.slane %v3521_v51, 5 }
  0xba   : > { %v576_v52 = vpop.f32.mrf.mxu0 }
  0xbb   : > { %v605_v53 = vpop.f32.mrf.mxu1  ;;  %v577_v54 = vadd.f32 %v3512_v44, %v576_v52  ;;  %v638_v5 = vsel %vm637_vm0, %v3521_v51, %v632_v57 }
  0xbd   : > { %v606_v56 = vadd.f32 %v605_v53, %v577_v54  ;;  %v3105_v54 = vld [vmem:[%s4089_s3 + $0x40] sm:$0xff] }
  0xbf   : > { %v3528_v58 = vmax.f32 %v606_v56, 0.0 }
  0xc1   : > { %v983_v62 = vrot.slane %v3528_v58, 5  ;;  %v3537_v63 = vrot.slane %v3528_v58, 6  ;;  %v1073_v0 = vrot.slane %v3528_v58, 7  ;;  %v635_v1 = vrot.slane %v3528_v58, 2 }
  0xc2   : > { %v579_v3 = vpop.f32.mrf.mxu0  ;;  %v721_v2 = vrot.slane %v3528_v58, 3 }
  0xc3   : > { %v608_v4 = vpop.f32.mrf.mxu1  ;;  %v580_v6 = vadd.f32 %v3512_v44, %v579_v3  ;;  %v640_v7 = vsel %vm639_vm1, %v638_v5, %v635_v1  ;;  %v987_v9 = vsel %vm637_vm0, %v981_v60, %v983_v62  ;;  %v1075_v10 = vsel %vm637_vm0, %v1071_v61, %v3537_v63 }
  0xc4   : > { %v641_v11 = vpack.c.bf16 %v635_v1, %v640_v7  ;;  %v3558_v12 = vsel %vm639_vm1, %v987_v9, %v3537_v63  ;;  %v1076_v13 = vsel %vm639_vm1, %v1075_v10, %v1073_v0  ;;  %v719_v62 = vrot.slane %v3521_v51, 2 }
  0xc5   : > { %v989_v14 = vpack.c.bf16 %v3537_v63, %v3558_v12  ;;  %v3563_v15 = vpack.c.bf16 %v1073_v0, %v1076_v13  ;;  %v609_v16 = vadd.f32 %v608_v4, %v580_v6 }
  0xc6   : > { %2474 = vmatmul.msk.bf16.vlgmr.msra.gmra.mxu3 %vm672_vm2, %v641_v11  ;;  %v723_v6 = vsel %vm637_vm0, %v632_v57, %v719_v62 }
  0xc7   : > { %v625_v17 = vmax.f32 %v609_v16, 0.0  ;;  %885 = vmatpush.bf16.msra.mxu3 %v3108_v21  ;;  %v724_v8 = vsel %vm639_vm1, %v723_v6, %v721_v2 }
  0xc9   : > { %v762_v23 = vrot.slane %v625_v17, 2  ;;  %v647_v24 = vrot.slane %v625_v17, 1  ;;  %v1026_v27 = vrot.slane %v625_v17, 4  ;;  %v1114_v28 = vrot.slane %v625_v17, 5 }
  0xca   : > { %v581_v18 = vpop.f32.mrf.mxu0 }
  0xcb   : > { %v610_v19 = vpop.f32.mrf.mxu1  ;;  %v582_v20 = vadd.f32 %v3512_v44, %v581_v18  ;;  %v652_v36 = vsel %vm637_vm0, %v625_v17, %v647_v24  ;;  %v766_v38 = vsel %vm637_vm0, %v647_v24, %v762_v23  ;;  %886 = vmatpush.bf16.msra.mxu3 %v3107_v33 }
  0xcd   : > { %v611_v22 = vadd.f32 %v610_v19, %v582_v20  ;;  %v3110_v20 = vld [vmem:[%s4089_s3 + $0x68] sm:$0xff] }
  0xcf   : > { %v626_v25 = vmax.f32 %v611_v22, 0.0  ;;  %v725_v22 = vpack.c.bf16 %v721_v2, %v724_v8  ;;  %v3115_v8 = vld [vmem:[%s4089_s3 + $0x90] sm:$0xff] }
  0xd1   : > { %v1028_v29 = vrot.slane %v626_v25, 5  ;;  %v3573_v30 = vrot.slane %v626_v25, 6  ;;  %v1116_v31 = vrot.slane %v626_v25, 7  ;;  %v650_v32 = vrot.slane %v626_v25, 2 }
  0xd2   : > { %v584_v34 = vpop.f32.mrf.mxu0  ;;  %v764_v37 = vrot.slane %v626_v25, 3 }
  0xd3   : > { %v613_v35 = vpop.f32.mrf.mxu1  ;;  %v585_v40 = vadd.f32 %v3512_v44, %v584_v34  ;;  %v653_v41 = vsel %vm639_vm1, %v652_v36, %v650_v32  ;;  %v1032_v43 = vsel %vm637_vm0, %v1026_v27, %v1028_v29  ;;  %v1118_v45 = vsel %vm637_vm0, %v1114_v28, %v3573_v30  ;;  %v3109_v29 = vld [vmem:[%s4089_s3 + $0x60] sm:$0xff] }
  0xd4   : > { %v654_v46 = vpack.c.bf16 %v650_v32, %v653_v41  ;;  %v767_v47 = vsel %vm639_vm1, %v766_v38, %v764_v37  ;;  %v3594_v48 = vsel %vm639_vm1, %v1032_v43, %v3573_v30  ;;  %v1119_v49 = vsel %vm639_vm1, %v1118_v45, %v1116_v31 }
  0xd5   : > { %v768_v50 = vpack.c.bf16 %v764_v37, %v767_v47  ;;  %v1034_v52 = vpack.c.bf16 %v3573_v30, %v3594_v48  ;;  %v3599_v53 = vpack.c.bf16 %v1116_v31, %v1119_v49  ;;  %v614_v56 = vadd.f32 %v613_v35, %v585_v40 }
  0xd6   : > { %2465 = vmatmul.msk.bf16.vlgmr.msra.gmra.mxu2 %vm672_vm2, %v654_v46 }
  0xd7   : > { %2500 = vmatmul.msk.bf16.vlgmr.msrb.gmra.mxu3 %vm672_vm2, %v768_v50  ;;  %840 = vmatpush.bf16.msra.mxu2 %v3106_v42  ;;  %v627_v1 = vmax.f32 %v614_v56, 0.0 }
  0xd8   : > { %971 = vmatpush.bf16.msrb.mxu3 %v3112_v55 }
  0xd9   : > { %v895_v4 = vrot.slane %v627_v1, 2  ;;  %v806_v7 = vrot.slane %v627_v1, 1  ;;  %v1157_v9 = vrot.slane %v627_v1, 4  ;;  %v1247_v58 = vrot.slane %v627_v1, 5 }
  0xda   : > { %v586_v60 = vpop.f32.mrf.mxu0 }
  0xdb   : > { %v615_v61 = vpop.f32.mrf.mxu1  ;;  %v587_v0 = vadd.f32 %v3512_v44, %v586_v60  ;;  %841 = vmatpush.bf16.msra.mxu2 %v3105_v54  ;;  %v899_v19 = vsel %vm637_vm0, %v806_v7, %v895_v4  ;;  %v811_v39 = vsel %vm637_vm0, %v627_v1, %v806_v7  ;;  %v3114_v60 = vld [vmem:[%s4089_s3 + $0x88] sm:$0xff]  ;;  %v3116_v1 = vld [vmem:[%s4089_s3 + $0x98] sm:$0xff]  ;;  %v3113_v7 = vld [vmem:[%s4089_s3 + $0x80] sm:$0xff] }
  0xdc   : > { %972 = vmatpush.bf16.msrb.mxu3 %v3111_v59 }
  0xdd   : > { %v616_v3 = vadd.f32 %v615_v61, %v587_v0 }
  0xdf   : > { %v3615_v5 = vmax.f32 %v616_v3, 0.0 }
  0xe1   : > { %v897_v10 = vrot.slane %v3615_v5, 3  ;;  %v1159_v11 = vrot.slane %v3615_v5, 5  ;;  %v1249_v13 = vrot.slane %v3615_v5, 7  ;;  %v1161_v18 = vrot.slane %v3615_v5, 6 }
  0xe2   : > { %v589_v16 = vpop.f32.mrf.mxu0  ;;  %v809_v34 = vrot.slane %v3615_v5, 2  ;;  %v3126_v5 = vld [vmem:[%s4089_s3 + $0xe8] sm:$0xff] }
  0xe3   : > { %v618_v17 = vpop.f32.mrf.mxu1  ;;  %v590_v51 = vadd.f32 %v3512_v44, %v589_v16  ;;  %v1163_v57 = vsel %vm637_vm0, %v1157_v9, %v1159_v11  ;;  %v900_v21 = vsel %vm639_vm1, %v899_v19, %v897_v10  ;;  %v1251_v24 = vsel %vm637_vm0, %v1247_v58, %v1161_v18  ;;  %v3118_v9 = vld [vmem:[%s4089_s3 + $0xa8] sm:$0xff]  ;;  %v3120_v11 = vld [vmem:[%s4089_s3 + $0xb8] sm:$0xff]  ;;  %v3117_v16 = vld [vmem:[%s4089_s3 + $0xa0] sm:$0xff] }
  0xe4   : > { %v1164_v23 = vsel %vm639_vm1, %v1163_v57, %v1161_v18  ;;  %v1252_v26 = vsel %vm639_vm1, %v1251_v24, %v1249_v13  ;;  %v812_v42 = vsel %vm639_vm1, %v811_v39, %v809_v34  ;;  %v3127_v19 = vld [vmem:[%s4089_s3 + $0xf0] sm:$0xff]  ;;  %v3144_v39 = vld [vmem:[%s4091_s5 + $0x78] sm:$0xff] }
  0xe5   : > { %v1165_v25 = vpack.c.bf16 %v1161_v18, %v1164_v23  ;;  %v619_v27 = vadd.f32 %v618_v17, %v590_v51  ;;  %v3638_v28 = vpack.c.bf16 %v1249_v13, %v1252_v26  ;;  %v813_v61 = vpack.c.bf16 %v809_v34, %v812_v42  ;;  %v3119_v17 = vld [vmem:[%s4089_s3 + $0xb0] sm:$0xff]  ;;  %v3125_v18 = vld [vmem:[%s4089_s3 + $0xe0] sm:$0xff]  ;;  %v3132_v34 = vld [vmem:[%s4091_s5 + $0x18] sm:$0xff] }
  0xe6   : > { %2487 = vmatmul.msk.bf16.vlgmr.msrb.gmra.mxu2 %vm672_vm2, %v725_v22  ;;  %v901_v13 = vpack.c.bf16 %v897_v10, %v900_v21  ;;  %v3128_v10 = vld [vmem:[%s4089_s3 + $0xf8] sm:$0xff]  ;;  %1433 = vmatpush.bf16.msra.mxu1 %v3132_v34 }
  0xe7   : > { %2617 = vmatmul.msk.bf16.vlgmr.msrb.gmra.mxu0 %vm672_vm2, %v1165_v25  ;;  %928 = vmatpush.bf16.msrb.mxu2 %v3110_v20  ;;  %v629_v31 = vmax.f32 %v619_v27, 0.0 }
  0xe9   : > { %v851_v37 = vrot.slane %v629_v31, 1  ;;  %v938_v38 = vrot.slane %v629_v31, 2  ;;  %v1202_v41 = vrot.slane %v629_v31, 4 }
  0xea   : > { %v591_v32 = vpop.f32.mrf.mxu0 }
  0xeb   : > { %v592_v33 = vadd.f32 %v3512_v44, %v591_v32  ;;  %929 = vmatpush.bf16.msrb.mxu2 %v3109_v29  ;;  %v620_v35 = vpop.f32.mrf.mxu1  ;;  %v856_v49 = vsel %vm637_vm0, %v629_v31, %v851_v37  ;;  %v1290_v44 = vrot.slane %v629_v31, 5  ;;  %v942_v54 = vsel %vm637_vm0, %v851_v37, %v938_v38  ;;  %v3131_v38 = vld [vmem:[%s4091_s5 + $0x10] sm:$0xff] }
  0xec   : > { %1434 = vmatpush.bf16.msra.mxu1 %v3131_v38 }
  0xed   : > { %v621_v36 = vadd.f32 %v620_v35, %v592_v33  ;;  %v3136_v35 = vld [vmem:[%s4091_s5 + $0x38] sm:$0xff] }
  0xee   : > { %1394 = vmatpush.bf16.msra.mxu0 %v3136_v35 }
  0xef   : > { %v630_v40 = vmax.f32 %v621_v36, 0.0  ;;  %v3140_v36 = vld [vmem:[%s4091_s5 + $0x58] sm:$0xff] }
  0xf1   : > { %v854_v43 = vrot.slane %v630_v40, 2  ;;  %v940_v45 = vrot.slane %v630_v40, 3  ;;  %v1204_v46 = vrot.slane %v630_v40, 5  ;;  %v1292_v47 = vrot.slane %v630_v40, 7 }
  0xf2   : > { %v1206_v50 = vrot.slane %v630_v40, 6 }
  0xf3   : > { %v857_v55 = vsel %vm639_vm1, %v856_v49, %v854_v43  ;;  %v1208_v56 = vsel %vm637_vm0, %v1202_v41, %v1204_v46  ;;  %v943_v59 = vsel %vm639_vm1, %v942_v54, %v940_v45  ;;  %v3130_v46 = vld [vmem:[%s4091_s5 + $0x8] sm:$0xff] }
  0xf4   : > { %v858_v62 = vpack.c.bf16 %v854_v43, %v857_v55  ;;  %v1209_v0 = vsel %vm639_vm1, %v1208_v56, %v1206_v50  ;;  %v1294_v2 = vsel %vm637_vm0, %v1290_v44, %v1206_v50  ;;  %v944_v58 = vpack.c.bf16 %v940_v45, %v943_v59  ;;  %v3135_v43 = vld [vmem:[%s4091_s5 + $0x30] sm:$0xff]  ;;  %1435 = vmatpush.bf16.msra.mxu1 %v3130_v46  ;;  %v3134_v44 = vld [vmem:[%s4091_s5 + $0x28] sm:$0xff]  ;;  %v3129_v55 = vld [vmem:[%s4091_s5] sm:$0xff] }
  0xf5   : > { %v1210_v3 = vpack.c.bf16 %v1206_v50, %v1209_v0  ;;  %v1295_v4 = vsel %vm639_vm1, %v1294_v2, %v1292_v47  ;;  %v3139_v45 = vld [vmem:[%s4091_s5 + $0x50] sm:$0xff]  ;;  %1395 = vmatpush.bf16.msra.mxu0 %v3135_v43  ;;  %v3138_v50 = vld [vmem:[%s4091_s5 + $0x48] sm:$0xff]  ;;  %v3152_v2 = vld [vmem:[%s4091_s5 + $0xb8] sm:$0xff] }
  0xf6   : > { %2513 = vmatmul.msk.bf16.vlgmr.msra.gmra.mxu2 %vm672_vm2, %v813_v61  ;;  %2526 = vmatmul.msk.bf16.vlgmr.msra.gmra.mxu3 %vm672_vm2, %v858_v62  ;;  %v1296_v6 = vpack.c.bf16 %v1292_v47, %v1295_v4  ;;  %v3143_v47 = vld [vmem:[%s4091_s5 + $0x70] sm:$0xff]  ;;  %v3142_v56 = vld [vmem:[%s4091_s5 + $0x68] sm:$0xff]  ;;  %v3133_v61 = vld [vmem:[%s4091_s5 + $0x20] sm:$0xff] }
  0xf7   : > { %2630 = vmatmul.msk.bf16.vlgmr.msrb.gmra.mxu1 %vm672_vm2, %v1210_v3  ;;  %1016 = vmatpush.bf16.msra.mxu2 %v3114_v60  ;;  %v3137_v62 = vld [vmem:[%s4091_s5 + $0x40] sm:$0xff]  ;;  %v3148_v4 = vld [vmem:[%s4091_s5 + $0x98] sm:$0xff] }
  0xf8   : > { %1061 = vmatpush.bf16.msra.mxu3 %v3116_v1  ;;  %1436 = vmatpush.bf16.msra.mxu1 %v3129_v55  ;;  %v3141_v1 = vld [vmem:[%s4091_s5 + $0x60] sm:$0xff] }
  0xf9   : > { %1396 = vmatpush.bf16.msra.mxu0 %v3134_v44  ;;  %v3161_v46 = vld [vmem:[%s4091_s5 + $0x100] sm:$0xff] }
  0xfb   : > { %1017 = vmatpush.bf16.msra.mxu2 %v3113_v7  ;;  %v3151_v7 = vld [vmem:[%s4091_s5 + $0xb0] sm:$0xff] }
  0xfc   : > { %1062 = vmatpush.bf16.msra.mxu3 %v3115_v8  ;;  %1637 = vmatpush.bf16.msrb.mxu1 %v3152_v2  ;;  %v3160_v8 = vld [vmem:[%s4091_s5 + $0xf8] sm:$0xff]  ;;  %v3177_v2 = vld [vmem:[%s4093_s7 + $0x64] sm:$0xf] }
  0xfd   : > { %1397 = vmatpush.bf16.msra.mxu0 %v3133_v61 }
 0x100   : > { %1638 = vmatpush.bf16.msrb.mxu1 %v3151_v7  ;;  %v3180_v7 = vld [vmem:[%s4093_s7 + $0x74] sm:$0xf0] }
 0x101   : > { %1586 = vmatpush.bf16.msrb.mxu0 %v3148_v4  ;;  %v2932_v4 = vld [vmem:[%s4093_s7 + $0x68] sm:$0xf] }
 0x106   : > { %2539 = vmatmul.msk.bf16.vlgmr.msrb.gmra.mxu2 %vm672_vm2, %v901_v13  ;;  %2552 = vmatmul.msk.bf16.vlgmr.msrb.gmra.mxu3 %vm672_vm2, %v944_v58  ;;  %v3147_v58 = vld [vmem:[%s4091_s5 + $0x90] sm:$0xff] }
 0x107   : > { %1104 = vmatpush.bf16.msrb.mxu2 %v3118_v9  ;;  %1147 = vmatpush.bf16.msrb.mxu3 %v3120_v11 }
 0x108   : > { %1587 = vmatpush.bf16.msrb.mxu0 %v3147_v58  ;;  %v3178_v58 = vld [vmem:[%s4093_s7 + $0x6c] sm:$0xf] }
 0x10b   : > { %1105 = vmatpush.bf16.msrb.mxu2 %v3117_v16  ;;  %1148 = vmatpush.bf16.msrb.mxu3 %v3119_v17  ;;  %v3155_v16 = vld [vmem:[%s4091_s5 + $0xd0] sm:$0xff]  ;;  %v3150_v17 = vld [vmem:[%s4091_s5 + $0xa8] sm:$0xff] }
 0x10c   : > { %1639 = vmatpush.bf16.msrb.mxu1 %v3150_v17  ;;  %v3173_v17 = vld [vmem:[%s4093_s7 + $0x44] sm:$0xf] }
 0x116   : > { %2565 = vmatmul.msk.bf16.vlgmr.msra.gmra.mxu2 %vm672_vm2, %v989_v14  ;;  %2578 = vmatmul.msk.bf16.vlgmr.msra.gmra.mxu3 %vm672_vm2, %v1034_v52 }
 0x117   : > { %1280 = vmatpush.bf16.msra.mxu2 %v3126_v5  ;;  %1323 = vmatpush.bf16.msra.mxu3 %v3128_v10  ;;  %v3159_v5 = vld [vmem:[%s4091_s5 + $0xf0] sm:$0xff] }
 0x11b   : > { %1281 = vmatpush.bf16.msra.mxu2 %v3125_v18  ;;  %1324 = vmatpush.bf16.msra.mxu3 %v3127_v19  ;;  %v3146_v18 = vld [vmem:[%s4091_s5 + $0x88] sm:$0xff] }
 0x11c   : > { %v3154_v19 = vld [vmem:[%s4091_s5 + $0xc8] sm:$0xff]  ;;  %1588 = vmatpush.bf16.msrb.mxu0 %v3146_v18 }
 0x11d   : > { %v2916_v18 = vld [vmem:[%s4093_s7 + $0x48] sm:$0xf] }
 0x126   : > { %2591 = vmatmul.msk.bf16.vlgmr.msrb.gmra.mxu2 %vm672_vm2, %v3563_v15  ;;  %2604 = vmatmul.msk.bf16.vlgmr.msrb.gmra.mxu3 %vm672_vm2, %v3599_v53 }
 0x127   : > { %1484 = vmatpush.bf16.msrb.mxu2 %v3140_v36  ;;  %1535 = vmatpush.bf16.msrb.mxu3 %v3144_v39 }
 0x12b   : > { %1485 = vmatpush.bf16.msrb.mxu2 %v3139_v45  ;;  %1536 = vmatpush.bf16.msrb.mxu3 %v3143_v47 }
 0x12f   : > { %1486 = vmatpush.bf16.msrb.mxu2 %v3138_v50  ;;  %1537 = vmatpush.bf16.msrb.mxu3 %v3142_v56 }
 0x133   : > { %1487 = vmatpush.bf16.msrb.mxu2 %v3137_v62  ;;  %1538 = vmatpush.bf16.msrb.mxu3 %v3141_v1 }
 0x136   : > { %2643 = vmatmul.msk.bf16.vlgmr.msra.gmra.mxu2 %vm672_vm2, %v3638_v28  ;;  %2656 = vmatmul.msk.bf16.vlgmr.msra.gmra.mxu3 %vm672_vm2, %v1296_v6  ;;  %v3156_v6 = vld [vmem:[%s4091_s5 + $0xd8] sm:$0xff] }
 0x137   : > { %1688 = vmatpush.bf16.msra.mxu2 %v3156_v6  ;;  %1739 = vmatpush.bf16.msra.mxu3 %v3160_v8  ;;  %v2924_v8 = vld [vmem:[%s4093_s7 + $0x60] sm:$0xf] }
 0x13b   : > { %1689 = vmatpush.bf16.msra.mxu2 %v3155_v16  ;;  %1740 = vmatpush.bf16.msra.mxu3 %v3159_v5  ;;  %v2934_v16 = vld [vmem:[%s4093_s7 + $0x78] sm:$0xf0] }
 0x13c   : > { %v2937_v5 = vor.u32 %v3178_v58, %v2934_v16  ;;  %v3185_v58 = vld [vmem:[%s4095_s9 + $0x20] sm:$0xff] }
 0x13d   : > { %v3209_v16 = vld [vmem:[%s4095_s9 + $0xe0] sm:$0xff] }
 0x13f   : > { %1690 = vmatpush.bf16.msra.mxu2 %v3154_v19  ;;  %v3176_v19 = vld [vmem:[%s4093_s7 + $0x54] sm:$0xf0] }
 0x149   : > { %v714_v63 = vpop.f32.mrf.mxu3 }
 0x151   : > { %v716_v30 = vpop.f32.mrf.mxu3 }
 0x159   : > { %v685_v12 = vpop.f32.mrf.mxu2 }
 0x15a   : > { %v715_v14 = vadd.f32 %v714_v63, %v685_v12  ;;  %v798_v51 = vpop.f32.mrf.mxu3  ;;  %v3149_v63 = vld [vmem:[%s4091_s5 + $0xa0] sm:$0xff]  ;;  %v3158_v12 = vld [vmem:[%s4091_s5 + $0xe8] sm:$0xff] }
 0x15b   : > { %1640 = vmatpush.bf16.msrb.mxu1 %v3149_v63  ;;  %1741 = vmatpush.bf16.msra.mxu3 %v3158_v12  ;;  %v2917_v12 = vor.u32 %v3176_v19, %v2916_v18 }
 0x161   : > { %v687_v48 = vpop.f32.mrf.mxu2 }
 0x162   : > { %v717_v52 = vadd.f32 %v716_v30, %v687_v48  ;;  %v800_v20 = vpop.f32.mrf.mxu3  ;;  %v3145_v30 = vld [vmem:[%s4091_s5 + $0x80] sm:$0xff] }
 0x163   : > { %v3153_v48 = vld [vmem:[%s4091_s5 + $0xc0] sm:$0xff]  ;;  %1589 = vmatpush.bf16.msrb.mxu0 %v3145_v30  ;;  %v3175_v30 = vld [vmem:[%s4093_s7 + $0x4c] sm:$0xf0] }
 0x164   : > { %1691 = vmatpush.bf16.msra.mxu2 %v3153_v48  ;;  %v3174_v48 = vld [vmem:[%s4093_s7 + $0x4c] sm:$0xf] }
 0x169   : > { %v755_v57 = vpop.f32.mrf.mxu2 }
 0x16a   : > { %v760_v33 = vadd.f32 %v755_v57, %v715_v14  ;;  %v1195_v57 = vpop.f32.mrf.mxu0 }
 0x16c   : > { %v803_v37 = vadd.f32 %v798_v51, %v760_v33 }
 0x171   : > { %v757_v21 = vpop.f32.mrf.mxu2 }
 0x172   : > { %v761_v22 = vadd.f32 %v757_v21, %v717_v52  ;;  %v3157_v21 = vld [vmem:[%s4091_s5 + $0xe0] sm:$0xff]  ;;  %v1197_v43 = vpop.f32.mrf.mxu0 }
 0x173   : > { %1742 = vmatpush.bf16.msra.mxu3 %v3157_v21 }
 0x174   : > { %v804_v15 = vadd.f32 %v800_v20, %v761_v22  ;;  %v1240_v22 = vpop.f32.mrf.mxu1 }
 0x179   : > { %v843_v23 = vpop.f32.mrf.mxu2  ;;  %v888_v24 = vpop.f32.mrf.mxu3 }
 0x17a   : > { %v848_v42 = vadd.f32 %v843_v23, %v803_v37  ;;  %v3164_v37 = vld [vmem:[%s4091_s5 + $0x118] sm:$0xff] }
 0x17c   : > { %v893_v49 = vadd.f32 %v888_v24, %v848_v42  ;;  %v3162_v42 = vld [vmem:[%s4091_s5 + $0x108] sm:$0xff]  ;;  %v1242_v47 = vpop.f32.mrf.mxu1 }
 0x181   : > { %v845_v53 = vpop.f32.mrf.mxu2  ;;  %v890_v25 = vpop.f32.mrf.mxu3 }
 0x182   : > { %v849_v26 = vadd.f32 %v845_v53, %v804_v15 }
 0x184   : > { %v3714_v27 = vadd.f32 %v890_v25, %v849_v26  ;;  %v3253_v25 = vld [vmem:[%s4090_s4] ss:$0 sm:$0xff] }
 0x189   : > { %v931_v28 = vpop.f32.mrf.mxu2  ;;  %v974_v29 = vpop.f32.mrf.mxu3 }
 0x18a   : > { %v936_v54 = vadd.f32 %v931_v28, %v893_v49 }
 0x18c   : > { %v979_v0 = vadd.f32 %v974_v29, %v936_v54 }
 0x191   : > { %v3716_v31 = vpop.f32.mrf.mxu2  ;;  %v3718_v32 = vpop.f32.mrf.mxu3 }
 0x192   : > { %v937_v24 = vadd.f32 %v3716_v31, %v3714_v27 }
 0x194   : > { %v980_v29 = vadd.f32 %v3718_v32, %v937_v24 }
 0x199   : > { %v1019_v40 = vpop.f32.mrf.mxu2  ;;  %v1064_v41 = vpop.f32.mrf.mxu3 }
 0x19a   : > { %v1024_v3 = vadd.f32 %v1019_v40, %v979_v0  ;;  %v3163_v40 = vld [vmem:[%s4091_s5 + $0x110] sm:$0xff] }
 0x19c   : > { %v1069_v13 = vadd.f32 %v1064_v41, %v1024_v3  ;;  %v2926_v3 = vld [vmem:[%s4093_s7 + $0x70] sm:$0xf0] }
 0x19d   : > { %v2929_v6 = vor.u32 %v3177_v2, %v2926_v3 }
 0x1a1   : > { %v3759_v59 = vpop.f32.mrf.mxu2  ;;  %v3761_v60 = vpop.f32.mrf.mxu3 }
 0x1a2   : > { %v1025_v34 = vadd.f32 %v3759_v59, %v980_v29  ;;  %v3170_v29 = vld [vmem:[%s4093_s7 + $0x2c] sm:$0xf] }
 0x1a4   : > { %v1070_v27 = vadd.f32 %v3761_v60, %v1025_v34 }
 0x1a9   : > { %v1107_v9 = vpop.f32.mrf.mxu2  ;;  %v1150_v11 = vpop.f32.mrf.mxu3 }
 0x1aa   : > { %v1112_v10 = vadd.f32 %v1107_v9, %v1069_v13  ;;  %v3179_v9 = vld [vmem:[%s4093_s7 + $0x6c] sm:$0xf0] }
 0x1ab   : > { %v2925_v13 = vor.u32 %v3179_v9, %v2924_v8  ;;  %v3210_v8 = vld [vmem:[%s4095_s9 + $0xe8] sm:$0xff] }
 0x1ac   : > { %v1155_v14 = vadd.f32 %v1150_v11, %v1112_v10  ;;  %v2933_v11 = vor.u32 %v3180_v7, %v2932_v4  ;;  %v2910_v10 = vld [vmem:[%s4093_s7 + $0x50] sm:$0xf0]  ;;  %v3186_v7 = vld [vmem:[%s4095_s9 + $0x28] sm:$0xff] }
 0x1ad   : > { %v2913_v63 = vor.u32 %v3173_v17, %v2910_v10  ;;  %v3194_v9 = vld [vmem:[%s4095_s9 + $0x68] sm:$0xff]  ;;  %v3201_v10 = vld [vmem:[%s4095_s9 + $0xa0] sm:$0xff] }
 0x1ae   : > { %v1200_v20 = vadd.f32 %v1195_v57, %v1155_v14  ;;  %v2908_v14 = vld [vmem:[%s4093_s7 + $0x40] sm:$0xf] }
 0x1b0   : > { %v1245_v15 = vadd.f32 %v1240_v22, %v1200_v20  ;;  %v3169_v22 = vld [vmem:[%s4093_s7 + $0x24] sm:$0xf] }
 0x1b1   : > { %v1109_v52 = vpop.f32.mrf.mxu2  ;;  %v1152_v51 = vpop.f32.mrf.mxu3 }
 0x1b2   : > { %v1113_v39 = vadd.f32 %v1109_v52, %v1070_v27  ;;  %v2909_v52 = vor.u32 %v3175_v30, %v2908_v14  ;;  %v2884_v27 = vld [vmem:[%s4093_s7 + $0x8] sm:$0xf]  ;;  %v3184_v14 = vld [vmem:[%s4095_s9 + $0x18] sm:$0xff] }
 0x1b3   : > { %v3208_v30 = vld [vmem:[%s4095_s9 + $0xd8] sm:$0xff] }
 0x1b4   : > { %v1156_v41 = vadd.f32 %v1152_v51, %v1113_v39  ;;  %v2918_v51 = vld [vmem:[%s4093_s7 + $0x58] sm:$0xf0]  ;;  %v2876_v39 = vld [vmem:[%s4093_s7] sm:$0xf] }
 0x1b5   : > { %v2921_v20 = vor.u32 %v3174_v48, %v2918_v51  ;;  %v3200_v51 = vld [vmem:[%s4095_s9 + $0x98] sm:$0xff] }
 0x1b6   : > { %v1201_v45 = vadd.f32 %v1197_v43, %v1156_v41 }
 0x1b8   : > { %v1246_v44 = vadd.f32 %v1242_v47, %v1201_v45  ;;  %v3166_v45 = vld [vmem:[%s4093_s7 + $0xc] sm:$0xf] }
 0x1b9   : > { %v1283_v23 = vpop.f32.mrf.mxu2  ;;  %v1326_v26 = vpop.f32.mrf.mxu3 }
 0x1ba   : > { %v1288_v53 = vadd.f32 %v1283_v23, %v1245_v15  ;;  %v2894_v15 = vld [vmem:[%s4093_s7 + $0x30] sm:$0xf0]  ;;  %v2900_v23 = vld [vmem:[%s4093_s7 + $0x28] sm:$0xf] }
 0x1bb   : > { %v2897_v24 = vor.u32 %v3169_v22, %v2894_v15 }
 0x1bc   : > { %v1331_v28 = vadd.f32 %v1326_v26, %v1288_v53  ;;  %v3172_v53 = vld [vmem:[%s4093_s7 + $0x34] sm:$0xf0] }
 0x1bd   : > { %v2901_v26 = vor.u32 %v3172_v53, %v2900_v23  ;;  %v1800_v53 = vld [vmem:[%s4092_s6] sm:$0x1] }
 0x1be   : > { %v1337_v33 = vadd.f32 %v3253_v25, %v1331_v28  ;;  %v3171_v28 = vld [vmem:[%s4093_s7 + $0x2c] sm:$0xf0] }
 0x1c0   : > { %v1339_v35 = vmax.f32 %v1337_v33, 0.0  ;;  %v2902_v33 = vld [vmem:[%s4093_s7 + $0x38] sm:$0xf0] }
 0x1c1   : > { %v1285_v49 = vpop.f32.mrf.mxu2  ;;  %v1328_v60 = vpop.f32.mrf.mxu3 }
 0x1c2   : > { %v1341_v36 = vpack.c.bf16 %v1339_v35, %v1339_v35  ;;  %v1289_v54 = vadd.f32 %v1285_v49, %v1246_v44  ;;  %v2905_v35 = vor.u32 %v3170_v29, %v2902_v33 }
 0x1c4   : > { %2698 = vmatmul.msk.bf16.vlgmr.msra.gmra.mxu1 %vm1386_vm3, %v1341_v36  ;;  %v1360_v31 = vshrl.u32 %v1341_v36, 16  ;;  %v1452_v38 = vrot.slane %v1341_v36, 1  ;;  %v1554_v55 = vrot.slane %v1341_v36, 2  ;;  %v1656_v56 = vrot.slane %v1341_v36, 3  ;;  %v3165_v36 = vld [vmem:[%s4093_s7 + $0x4] sm:$0xf] }
 0x1c5   : > { %v1332_v61 = vadd.f32 %v1328_v60, %v1289_v54  ;;  %1917 = vmatpush.bf16.msra.mxu1 %v2925_v13  ;;  %v3212_v54 = vld [vmem:[%s4095_s9 + $0xf8] sm:$0xff]  ;;  %v3211_v60 = vld [vmem:[%s4095_s9 + $0xf0] sm:$0xff] }
 0x1c6   : > { %2681 = vmatmul.msk.bf16.vlgmr.msra.gmra.mxu0 %vm1386_vm3, %v1360_v31  ;;  %2723 = vmatmul.msk.bf16.vlgmr.msrb.gmra.mxu2 %vm1386_vm3, %v1452_v38  ;;  %v1503_v32 = vrot.slane %v1360_v31, 1  ;;  %v1605_v50 = vrot.slane %v1360_v31, 2  ;;  %v1707_v59 = vrot.slane %v1360_v31, 3  ;;  %v3168_v38 = vld [vmem:[%s4093_s7 + $0x14] sm:$0xf0] }
 0x1c7   : > { %1790 = vmatpush.bf16.msra.mxu0 %v3164_v37  ;;  %v1338_v62 = vadd.f32 %v3253_v25, %v1332_v61  ;;  %1930 = vmatpush.bf16.msrb.mxu2 %v2929_v6  ;;  %v2892_v25 = vld [vmem:[%s4093_s7 + $0x20] sm:$0xf]  ;;  %v2878_v37 = vld [vmem:[%s4093_s7 + $0x10] sm:$0xf0] }
 0x1c8   : > { %2748 = vmatmul.msk.bf16.vlgmr.msrb.gmra.mxu3 %vm1386_vm3, %v1503_v32  ;;  %v2893_v34 = vor.u32 %v3171_v28, %v2892_v25  ;;  %v2881_v31 = vor.u32 %v3165_v36, %v2878_v37  ;;  %v3167_v32 = vld [vmem:[%s4093_s7 + $0xc] sm:$0xf0] }
 0x1c9   : > { %v1340_v0 = vmax.f32 %v1338_v62, 0.0  ;;  %1943 = vmatpush.bf16.msrb.mxu3 %v2933_v11  ;;  %1918 = vmatpush.bf16.msra.mxu1 %v2909_v52  ;;  %v2877_v43 = vor.u32 %v3167_v32, %v2876_v39  ;;  %v3195_v62 = vld [vmem:[%s4095_s9 + $0x70] sm:$0xff]  ;;  %v3202_v11 = vld [vmem:[%s4095_s9 + $0xa8] sm:$0xff]  ;;  %v3192_v52 = vld [vmem:[%s4095_s9 + $0x58] sm:$0xff] }
 0x1ca   : > { %v3191_v36 = vld [vmem:[%s4095_s9 + $0x50] sm:$0xff]  ;;  %v3198_v39 = vld [vmem:[%s4095_s9 + $0x88] sm:$0xff]  ;;  %v3189_v32 = vld [vmem:[%s4095_s9 + $0x40] sm:$0xff] }
 0x1cb   : > { %1791 = vmatpush.bf16.msra.mxu0 %v3163_v40  ;;  %v1749_v1 = vpack.c.bf16 %v1340_v0, %v1340_v0  ;;  %1931 = vmatpush.bf16.msrb.mxu2 %v2913_v63  ;;  %v3203_v0 = vld [vmem:[%s4095_s9 + $0xb0] sm:$0xff] }
 0x1cc   : > { %v3199_v37 = vld [vmem:[%s4095_s9 + $0x90] sm:$0xff] }
 0x1cd   : > { %1944 = vmatpush.bf16.msrb.mxu3 %v2917_v12  ;;  %1919 = vmatpush.bf16.msra.mxu1 %v2893_v34  ;;  %v3182_v34 = vld [vmem:[%s4095_s9 + $0x8] sm:$0xff] }
 0x1cf   : > { %1792 = vmatpush.bf16.msra.mxu0 %v3162_v42  ;;  %1932 = vmatpush.bf16.msrb.mxu2 %v2897_v24  ;;  %v2885_v42 = vor.u32 %v3168_v38, %v2884_v27  ;;  %v3181_v27 = vld [vmem:[%s4095_s9] sm:$0xff]  ;;  %v3190_v38 = vld [vmem:[%s4095_s9 + $0x48] sm:$0xff] }
 0x1d1   : > { %1945 = vmatpush.bf16.msrb.mxu3 %v2901_v26  ;;  %1920 = vmatpush.bf16.msra.mxu1 %v2877_v43 }
 0x1d3   : > { %1793 = vmatpush.bf16.msra.mxu0 %v3161_v46  ;;  %v2886_v46 = vld [vmem:[%s4093_s7 + $0x18] sm:$0xf0]  ;;  %1933 = vmatpush.bf16.msrb.mxu2 %v2881_v31  ;;  %v3205_v31 = vld [vmem:[%s4095_s9 + $0xc0] sm:$0xff] }
 0x1d4   : > { %2798 = vmatmul.msk.bf16.vlgmr.msrb.gmra.mxu1 %vm1386_vm3, %v1605_v50  ;;  %v2889_v47 = vor.u32 %v3166_v45, %v2886_v46  ;;  %v3188_v50 = vld [vmem:[%s4095_s9 + $0x38] sm:$0xff] }
 0x1d5   : > { %1946 = vmatpush.bf16.msrb.mxu3 %v2885_v42  ;;  %2230 = vmatpush.bf16.msrb.mxu1 %v3188_v50 }
 0x1d6   : > { %2773 = vmatmul.msk.bf16.vlgmr.msrb.gmra.mxu0 %vm1386_vm3, %v1554_v55  ;;  %2823 = vmatmul.msk.bf16.vlgmr.msra.gmra.mxu2 %vm1386_vm3, %v1656_v56  ;;  %v3196_v55 = vld [vmem:[%s4095_s9 + $0x78] sm:$0xff] }
 0x1d7   : > { %1956 = vmatpush.bf16.msrb.mxu0 %v2937_v5  ;;  %v3204_v56 = vld [vmem:[%s4095_s9 + $0xb8] sm:$0xff]  ;;  %2243 = vmatpush.bf16.msra.mxu2 %v3196_v55  ;;  %v3193_v5 = vld [vmem:[%s4095_s9 + $0x60] sm:$0xff] }
 0x1d8   : > { %2848 = vmatmul.msk.bf16.vlgmr.msra.gmra.mxu3 %vm1386_vm3, %v1707_v59  ;;  %v3187_v59 = vld [vmem:[%s4095_s9 + $0x30] sm:$0xff] }
 0x1d9   : > { %2256 = vmatpush.bf16.msra.mxu3 %v3204_v56  ;;  %2231 = vmatpush.bf16.msrb.mxu1 %v3187_v59 }
 0x1db   : > { %1957 = vmatpush.bf16.msrb.mxu0 %v2921_v20  ;;  %2244 = vmatpush.bf16.msra.mxu2 %v3195_v62  ;;  %v3183_v20 = vld [vmem:[%s4095_s9 + $0x10] sm:$0xff] }
 0x1dd   : > { %2257 = vmatpush.bf16.msra.mxu3 %v3203_v0  ;;  %2232 = vmatpush.bf16.msrb.mxu1 %v3186_v7 }
 0x1df   : > { %1958 = vmatpush.bf16.msrb.mxu0 %v2905_v35  ;;  %2245 = vmatpush.bf16.msra.mxu2 %v3194_v9  ;;  %v3206_v35 = vld [vmem:[%s4095_s9 + $0xc8] sm:$0xff] }
 0x1e1   : > { %2258 = vmatpush.bf16.msra.mxu3 %v3202_v11  ;;  %2233 = vmatpush.bf16.msrb.mxu1 %v3185_v58  ;;  %v2037_v58 = vld [vmem:[%s4096_s10] sm:$0x1] }
 0x1e3   : > { %1959 = vmatpush.bf16.msrb.mxu0 %v2889_v47  ;;  %2246 = vmatpush.bf16.msra.mxu2 %v3193_v5 }
 0x1e5   : > { %2259 = vmatpush.bf16.msra.mxu3 %v3201_v10  ;;  %2234 = vmatpush.bf16.msrb.mxu1 %v3184_v14 }
 0x1e6   : > { %2873 = vmatmul.msk.bf16.vlgmr.msra.gmra.mxu0 %vm1386_vm3, %v1749_v1 }
 0x1e7   : > { %2269 = vmatpush.bf16.msra.mxu0 %v3212_v54  ;;  %2247 = vmatpush.bf16.msra.mxu2 %v3192_v52 }
 0x1e9   : > { %2260 = vmatpush.bf16.msra.mxu3 %v3200_v51  ;;  %2235 = vmatpush.bf16.msrb.mxu1 %v3183_v20 }
 0x1eb   : > { %2270 = vmatpush.bf16.msra.mxu0 %v3211_v60  ;;  %2248 = vmatpush.bf16.msra.mxu2 %v3191_v36 }
 0x1ed   : > { %2236 = vmatpush.bf16.msrb.mxu1 %v3182_v34  ;;  %2261 = vmatpush.bf16.msra.mxu3 %v3199_v37 }
 0x1ef   : > { %2271 = vmatpush.bf16.msra.mxu0 %v3210_v8  ;;  %2249 = vmatpush.bf16.msra.mxu2 %v3190_v38 }
 0x1f1   : > { %2237 = vmatpush.bf16.msrb.mxu1 %v3181_v27  ;;  %2262 = vmatpush.bf16.msra.mxu3 %v3198_v39 }
 0x1f3   : > { %2272 = vmatpush.bf16.msra.mxu0 %v3209_v16  ;;  %2250 = vmatpush.bf16.msra.mxu2 %v3189_v32 }
 0x1f7   : > { %2273 = vmatpush.bf16.msra.mxu0 %v3208_v30 }
 0x241   : > { %v1438_v57 = vpop.f32.mrf.mxu1 }
 0x243   : > { %v1399_v21 = vpop.f32.mrf.mxu0 }
 0x244   : > { %v1439_v61 = vadd.f32 %v1438_v57, %v1399_v21  ;;  %v3207_v21 = vld [vmem:[%s4095_s9 + $0xd0] sm:$0xff] }
 0x245   : > { %2274 = vmatpush.bf16.msra.mxu0 %v3207_v21 }
 0x249   : > { %v1440_v40 = vpop.f32.mrf.mxu1  ;;  %v1489_v41 = vpop.f32.mrf.mxu2  ;;  %2275 = vmatpush.bf16.msra.mxu0 %v3206_v35 }
 0x24a   : > { %v1493_v3 = vadd.f32 %v1489_v41, %v1439_v61  ;;  %v3197_v40 = vld [vmem:[%s4095_s9 + $0x80] sm:$0xff] }
 0x24b   : > { %v1401_v49 = vpop.f32.mrf.mxu0  ;;  %v1540_v44 = vpop.f32.mrf.mxu3  ;;  %2263 = vmatpush.bf16.msra.mxu3 %v3197_v40  ;;  %v1820_v41 = vld [vmem:[%s4094_s8] sm:$0xf] }
 0x24c   : > { %v1544_v13 = vadd.f32 %v1540_v44, %v1493_v3  ;;  %v1902_v42 = vperm.slane %v1820_v41, 0  ;;  %v1905_v43 = vperm.slane %v1820_v41, 3  ;;  %v1903_v50 = vperm.slane %v1820_v41, 1 }
 0x24d   : > { %2276 = vmatpush.bf16.msra.mxu0 %v3205_v31  ;;  %v1904_v55 = vperm.slane %v1820_v41, 2 }
 0x251   : > { %v1491_v1 = vpop.f32.mrf.mxu2  ;;  %v1642_v2 = vpop.f32.mrf.mxu1 }
 0x253   : > { %v1542_v4 = vpop.f32.mrf.mxu3  ;;  %v1591_v6 = vpop.f32.mrf.mxu0 }
 0x254   : > { %v1595_v17 = vadd.f32 %v1591_v6, %v1544_v13 }
 0x256   : > { %v1646_v48 = vadd.f32 %v1642_v2, %v1595_v17 }
 0x259   : > { %v1644_v18 = vpop.f32.mrf.mxu1  ;;  %v1693_v19 = vpop.f32.mrf.mxu2 }
 0x25a   : > { %v1697_v57 = vadd.f32 %v1693_v19, %v1646_v48 }
 0x25b   : > { %v1593_v63 = vpop.f32.mrf.mxu0  ;;  %v1744_v12 = vpop.f32.mrf.mxu3 }
 0x25c   : > { %v1748_v15 = vadd.f32 %v1744_v12, %v1697_v57 }
 0x261   : > { %v1695_v22 = vpop.f32.mrf.mxu2 }
 0x263   : > { %v1746_v23 = vpop.f32.mrf.mxu3  ;;  %v1795_v24 = vpop.f32.mrf.mxu0 }
 0x264   : > { %v1799_v25 = vadd.f32 %v1795_v24, %v1748_v15 }
 0x266   : > { %v1801_v26 = vadd.f32 %v1800_v53, %v1799_v25 }
 0x268   : > { %v1802_v28 = vmax.f32 %v1801_v26, 0.0 }
 0x26a   : > { %v1803_v29 = vpack.c.bf16 %v1802_v28, %v1802_v28 }
 0x26b   : > { %v1797_v33 = vpop.f32.mrf.mxu0 }
 0x26c   : > { %2938 = vmatmul.msk.bf16.vlgmr.msra.gmra.mxu1 %vm1386_vm3, %v1803_v29  ;;  %2939 = vmatmul.msk.bf16.vlgmr.msrb.gmra.mxu2 %vm1386_vm3, %v1803_v29 }
 0x26d   : > { %2940 = vmatmul.msk.bf16.vlgmr.msrb.gmra.mxu3 %vm1386_vm3, %v1803_v29  ;;  %2941 = vmatmul.msk.bf16.vlgmr.msrb.gmra.mxu0 %vm1386_vm3, %v1803_v29 }
 0x2e9   : > { %v1922_v45 = vpop.f32.mrf.mxu1 }
 0x2ea   : > { %v1923_v46 = vadd.f32 %v1922_v45, %v1902_v42  ;;  %v1961_v47 = vpop.f32.mrf.mxu0 }
 0x2eb   : > { %v1962_v49 = vadd.f32 %v1961_v47, %v1905_v43 }
 0x2ec   : > { %v1965_v44 = vmax.f32 %v1923_v46, 0.0 }
 0x2ed   : > { %v1968_v54 = vmax.f32 %v1962_v49, 0.0 }
 0x2ee   : > { %v1969_v56 = vpack.c.bf16 %v1965_v44, %v1965_v44 }
 0x2ef   : > { %v1972_v59 = vpack.c.bf16 %v1968_v54, %v1968_v54  ;;  %v1935_v60 = vpop.f32.mrf.mxu2 }
 0x2f0   : > { %v1936_v61 = vadd.f32 %v1935_v60, %v1903_v50  ;;  %v1948_v62 = vpop.f32.mrf.mxu3  ;;  %2238 = vmatmul.bf16.vlgmr.msrb.gmra.mxu1 %v1969_v56 }
 0x2f1   : > { %v1949_v0 = vadd.f32 %v1948_v62, %v1904_v55  ;;  %2277 = vmatmul.bf16.vlgmr.msra.gmra.mxu0 %v1972_v59  ;;  %v1924_v1 = vpop.f32.mrf.mxu1 }
 0x2f2   : > { %v1966_v2 = vmax.f32 %v1936_v61, 0.0  ;;  %v1963_v3 = vpop.f32.mrf.mxu0 }
 0x2f3   : > { %v1967_v4 = vmax.f32 %v1949_v0, 0.0 }
 0x2f4   : > { %v1970_v6 = vpack.c.bf16 %v1966_v2, %v1966_v2 }
 0x2f5   : > { %v1971_v7 = vpack.c.bf16 %v1967_v4, %v1967_v4 }
 0x2f6   : > { %2251 = vmatmul.bf16.vlgmr.msra.gmra.mxu2 %v1970_v6 }
 0x2f7   : > { %2264 = vmatmul.bf16.vlgmr.msra.gmra.mxu3 %v1971_v7  ;;  %v1937_v8 = vpop.f32.mrf.mxu2 }
 0x2f8   : > { %v1950_v9 = vpop.f32.mrf.mxu3 }
 0x36d   : > { %v2239_v11 = vpop.f32.mrf.mxu1 }
 0x36e   : > { %v2278_v13 = vpop.f32.mrf.mxu0  ;;  %v2240_v5 = vadd.f32 %v2239_v11, %v2037_v58 }
 0x375   : > { %v2241_v16 = vpop.f32.mrf.mxu1 }
 0x376   : > { %v2280_v17 = vpop.f32.mrf.mxu0 }
 0x379   : > { %v2252_v10 = vpop.f32.mrf.mxu2 }
 0x37a   : > { %v2253_v18 = vadd.f32 %v2252_v10, %v2240_v5  ;;  %v2265_v19 = vpop.f32.mrf.mxu3 }
 0x37c   : > { %v2266_v63 = vadd.f32 %v2265_v19, %v2253_v18 }
 0x37e   : > { %v2279_v12 = vadd.f32 %v2278_v13, %v2266_v63 }
 0x380   : > { %2282 = vst [vmem:[%s378_s16] sm:$0x1] %v2279_v12 }
 0x381   : > { %v2254_v14 = vpop.f32.mrf.mxu2 }
 0x382   : > { %3281 = shalt.err (!%p3278_p3)
}
 0x383   : > { %3213 = dma.vmem_to_hbm [thread:$0]  (%p3416_p5), %s2295_s22, 16, %s2297_s24, %s2284_s25   ;;  %v2267_v30 = vpop.f32.mrf.mxu3 }
 0x384 PF: > { %p3219_p4 = scmp.ge.s32.totalorder %s3316_s20, 2  ;;  %s2308_s23 = sand.u32 1, %s3304_s17  }
 0x385   : > { %s2309_s14 = scalar_lea.sflag [#allocation3], %s2308_s23 }
 0x386   : > { %p3216_p7 = pnand %p3219_p4, %p3420_p6 }
 0x388   : > { %p3217_p8 = pneg %p3216_p7 }
 0x38a   : > { %3299 = dma.done.wait (%p3217_p8), %s2309_s14, 16  }
 0x38b   : > { %3301 = vsyncadd (%p3217_p8), %s2309_s14, 4294967280  ;;  %s4106_s20 = sld [smem:[#allocation6_spill]]  ;;  %s4109_s17 = smov %s3308_s18 }
 0x38c   : > { %s4107_s15 = sld [smem:[#allocation5_spill]] }
 0x38d   : > { %s4108_s19 = sld [smem:[#allocation7_spill]] }
 0x391   : > { %p21_p9 = scmp.ge.s32.totalorder %s4106_s20, 4  }
 0x392   : > { %s4110_s18 = smov %s4107_s15 }
 0x393   :  { %23 = sbr.rel (!%p21_p9) target bundleno = 3 (0x3), region = 122 }
 0x398   :  { %2314 = vsyncpa [#allocation3], 1 }
 0x399   :  { %2316 = vsyncpa [#allocation3 + $0x1], 1 }

</bundles_post_ra>
